<compile_context>
chip_gen: v7x
topology: tpu7x:2x2x1
jax: 0.10.0
libtpu: 0.0.40
codegen_flags: <defaults>
</compile_context>

<pallas_src>
import jax
import jax.numpy as jnp
from jax.experimental import pallas as pl
from jax.experimental.pallas import tpu as pltpu


def _sigmoid(x):
    return 1.0 / (1.0 + jnp.exp(-x))


def _decoder_step_kernel(
    # per-step teacher-forcing input
    dec_in_ref,                               # (1, B, mel_dim)
    # step-invariant inputs
    enc_ref,                                  # (B, T_enc, D_enc) attention memory
    mask_ref,                                 # (B, T_enc) additive mask (0 / -1e9)
    # prenet
    pre_w1, pre_b1, pre_w2, pre_b2,
    # attention LSTM cell (input weights split: prenet part / context part)
    arnn_wx, arnn_wc, arnn_wh, arnn_b,
    # memory layer + location-sensitive attention
    mem_w, query_w, loc_conv_w, loc_dense_w, attn_v,
    # decoder LSTM cell (input weights split: attn-hidden part / context part)
    drnn_wh_in, drnn_wc_in, drnn_whh, drnn_b,
    # projections (input weights split: decoder-hidden part / context part)
    mel_wh, mel_wc, mel_b, stop_wh, stop_wc, stop_b,
    # outputs
    mel_out_ref,                              # (1, B, r*mel_dim)
    attn_out_ref,                             # (1, B, T_enc)
    stop_out_ref,                             # (1, B, 1)
    # carried state (VMEM scratch persists across grid steps)
    pm_ref,                                   # (B, T_enc, attn_dim) processed memory
    ah_ref, ac_ref,                           # attention LSTM h / c
    dh_ref, dc_ref,                           # decoder LSTM h / c
    ctx_ref,                                  # attention context (B, D_enc)
    cw_ref,                                   # cumulative attention weights (B, T_enc)
):
    step = pl.program_id(0)
    B, T_enc, D_enc = enc_ref.shape
    attn_units = ah_ref.shape[-1]
    dec_units = dh_ref.shape[-1]
    attn_dim = pm_ref.shape[-1]

    @pl.when(step == 0)
    def _init():
        ah_ref[...] = jnp.zeros_like(ah_ref)
        ac_ref[...] = jnp.zeros_like(ac_ref)
        dh_ref[...] = jnp.zeros_like(dh_ref)
        dc_ref[...] = jnp.zeros_like(dc_ref)
        ctx_ref[...] = jnp.zeros_like(ctx_ref)
        cw_ref[...] = jnp.zeros_like(cw_ref)
        # processed_memory = memory_layer(encoder_outputs)  (Linear, no bias),
        # computed once and kept resident in VMEM scratch.
        enc2 = enc_ref[...].astype(jnp.float32).reshape(B * T_enc, D_enc)
        pm = jnp.dot(enc2, mem_w[...], preferred_element_type=jnp.float32)
        pm_ref[...] = pm.reshape(B, T_enc, attn_dim)

    # ---------------- Prenet (dropout = identity at eval time) ----------------
    x = dec_in_ref[0].astype(jnp.float32)                              # (B, mel_dim)
    h = jnp.dot(x, pre_w1[...], preferred_element_type=jnp.float32) + pre_b1[...]
    h = jnp.maximum(h, 0.0)
    h = jnp.dot(h, pre_w2[...], preferred_element_type=jnp.float32) + pre_b2[...]
    h = jnp.maximum(h, 0.0)                                            # (B, P2)

    # ------- Attention LSTM cell: input = [prenet(x), attention_context] -------
    ctx = ctx_ref[...]
    gates = (jnp.dot(h, arnn_wx[...], preferred_element_type=jnp.float32)
             + jnp.dot(ctx, arnn_wc[...], preferred_element_type=jnp.float32)
             + jnp.dot(ah_ref[...], arnn_wh[...], preferred_element_type=jnp.float32)
             + arnn_b[...])
    i_g = _sigmoid(gates[:, 0 * attn_units:1 * attn_units])
    f_g = _sigmoid(gates[:, 1 * attn_units:2 * attn_units])
    g_g = jnp.tanh(gates[:, 2 * attn_units:3 * attn_units])
    o_g = _sigmoid(gates[:, 3 * attn_units:4 * attn_units])
    ac_new = f_g * ac_ref[...] + i_g * g_g
    ah_new = o_g * jnp.tanh(ac_new)
    ah_ref[...] = ah_new
    ac_ref[...] = ac_new

    # ---------------------- Location-sensitive attention -----------------------
    q = jnp.dot(ah_new, query_w[...], preferred_element_type=jnp.float32)  # (B, attn_dim)
    cw = cw_ref[...]                                                       # (B, T_enc)
    ks = loc_conv_w.shape[0]
    pad = (ks - 1) // 2
    zpad = jnp.zeros((B, pad), jnp.float32)
    cw_pad = jnp.concatenate([zpad, cw, zpad], axis=1)                     # (B, T_enc+ks-1)
    # location conv (no bias) followed by location dense (no bias) are both
    # linear -> fuse them into one (ks, attn_dim) stencil (exact).
    stencil = jnp.dot(loc_conv_w[...], loc_dense_w[...],
                      preferred_element_type=jnp.float32)                  # (ks, attn_dim)
    loc_proj = jnp.zeros((B, T_enc, attn_dim), jnp.float32)
    for k in range(ks):                                                    # static unroll
        loc_proj = loc_proj + cw_pad[:, k:k + T_enc, None] * stencil[k, :][None, None, :]

    e = jnp.tanh(q[:, None, :] + pm_ref[...] + loc_proj)                   # (B, T_enc, attn_dim)
    energies = jnp.sum(e * attn_v[...][None, :, :], axis=-1)               # (B, T_enc)
    energies = energies + mask_ref[...].astype(jnp.float32)
    m = jnp.max(energies, axis=-1, keepdims=True)
    p = jnp.exp(energies - m)
    align = p / jnp.sum(p, axis=-1, keepdims=True)                         # (B, T_enc)
    enc_f = enc_ref[...].astype(jnp.float32)
    ctx_new = jnp.sum(align[:, :, None] * enc_f, axis=1)                   # (B, D_enc)
    cw_ref[...] = cw + align
    ctx_ref[...] = ctx_new

    # ------- Decoder LSTM cell: input = [attention_hidden, attention_context] --
    dgates = (jnp.dot(ah_new, drnn_wh_in[...], preferred_element_type=jnp.float32)
              + jnp.dot(ctx_new, drnn_wc_in[...], preferred_element_type=jnp.float32)
              + jnp.dot(dh_ref[...], drnn_whh[...], preferred_element_type=jnp.float32)
              + drnn_b[...])
    di = _sigmoid(dgates[:, 0 * dec_units:1 * dec_units])
    df = _sigmoid(dgates[:, 1 * dec_units:2 * dec_units])
    dg = jnp.tanh(dgates[:, 2 * dec_units:3 * dec_units])
    do = _sigmoid(dgates[:, 3 * dec_units:4 * dec_units])
    dc_new = df * dc_ref[...] + di * dg
    dh_new = do * jnp.tanh(dc_new)
    dh_ref[...] = dh_new
    dc_ref[...] = dc_new

    # --------------------------- Output projections ----------------------------
    mel = (jnp.dot(dh_new, mel_wh[...], preferred_element_type=jnp.float32)
           + jnp.dot(ctx_new, mel_wc[...], preferred_element_type=jnp.float32)
           + mel_b[...])                                                    # (B, r*mel_dim)
    stop = _sigmoid(jnp.dot(dh_new, stop_wh[...], preferred_element_type=jnp.float32)
                    + jnp.dot(ctx_new, stop_wc[...], preferred_element_type=jnp.float32)
                    + stop_b[...])                                          # (B, 1)

    mel_out_ref[0] = mel.astype(mel_out_ref.dtype)
    attn_out_ref[0] = align.astype(attn_out_ref.dtype)
    stop_out_ref[0] = stop.astype(stop_out_ref.dtype)


_WEIGHT_ORDER = (
    "pre_w1", "pre_b1", "pre_w2", "pre_b2",
    "arnn_wx", "arnn_wc", "arnn_wh", "arnn_b",
    "mem_w", "query_w", "loc_conv_w", "loc_dense_w", "attn_v",
    "drnn_wh_in", "drnn_wc_in", "drnn_whh", "drnn_b",
    "mel_wh", "mel_wc", "mel_b", "stop_wh", "stop_wc", "stop_b",
)


def tacotron2_decoder_forward(hp, params, encoder_outputs, mel_inputs,
                              memory_lengths=None):
    """Teacher-forcing Decoder.forward.

    Returns (mel_outputs (B, T_dec, mel_dim),
             stop_tokens (B, T_dec),
             attn_scores (B, T_dec // r, T_enc)).
    """
    B, T_enc, D_enc = encoder_outputs.shape
    r, mel_dim = hp["r"], hp["mel_dim"]
    T_dec = mel_inputs.shape[1]
    assert T_dec % r == 0, "decoder input length must be a multiple of r"
    n_steps = T_dec // r
    attn_units = hp["attention_rnn_units"]
    dec_units = hp["decoder_rnn_units"]
    attn_dim = hp["attention_dim"]

    # Teacher-forcing input per decoder step: zeros at step 0, afterwards the
    # last frame of the previous r-frame group (inputs[t-1] in the PyTorch code).
    prev = mel_inputs[:, r - 1:T_dec - 1:r, :]                     # (B, n_steps-1, mel)
    dec_in = jnp.concatenate(
        [jnp.zeros((B, 1, mel_dim), mel_inputs.dtype), prev], axis=1)
    dec_in = jnp.transpose(dec_in, (1, 0, 2))                      # (n_steps, B, mel)

    if memory_lengths is None:
        attn_mask = jnp.zeros((B, T_enc), jnp.float32)
    else:
        pos = jnp.arange(T_enc, dtype=jnp.int32)[None, :]
        attn_mask = jnp.where(pos < memory_lengths[:, None], 0.0,
                              -1e9).astype(jnp.float32)

    weights = [params[name] for name in _WEIGHT_ORDER]

    def const_spec(shape):
        nd = len(shape)
        return pl.BlockSpec(shape, lambda k, _nd=nd: (0,) * _nd)

    in_specs = ([pl.BlockSpec((1, B, mel_dim), lambda k: (k, 0, 0)),
                 const_spec((B, T_enc, D_enc)),
                 const_spec((B, T_enc))]
                + [const_spec(w.shape) for w in weights])

    out_shape = (jax.ShapeDtypeStruct((n_steps, B, r * mel_dim), jnp.float32),
                 jax.ShapeDtypeStruct((n_steps, B, T_enc), jnp.float32),
                 jax.ShapeDtypeStruct((n_steps, B, 1), jnp.float32))
    out_specs = (pl.BlockSpec((1, B, r * mel_dim), lambda k: (k, 0, 0)),
                 pl.BlockSpec((1, B, T_enc), lambda k: (k, 0, 0)),
                 pl.BlockSpec((1, B, 1), lambda k: (k, 0, 0)))

    scratch_shapes = [
        pltpu.VMEM((B, T_enc, attn_dim), jnp.float32),   # processed memory
        pltpu.VMEM((B, attn_units), jnp.float32),        # attention LSTM h
        pltpu.VMEM((B, attn_units), jnp.float32),        # attention LSTM c
        pltpu.VMEM((B, dec_units), jnp.float32),         # decoder LSTM h
        pltpu.VMEM((B, dec_units), jnp.float32),         # decoder LSTM c
        pltpu.VMEM((B, D_enc), jnp.float32),             # attention context
        pltpu.VMEM((B, T_enc), jnp.float32),             # cumulative attn weights
    ]

    mel_raw, attn_raw, stop_raw = pl.pallas_call(
        _decoder_step_kernel,
        out_shape=out_shape,
        grid=(n_steps,),
        in_specs=in_specs,
        out_specs=out_specs,
        scratch_shapes=scratch_shapes,
        compiler_params=pltpu.CompilerParams(
            # grid axis is a true recurrence (state carried in scratch)
            dimension_semantics=("arbitrary",)),
    )(dec_in, encoder_outputs, attn_mask, *weights)

    mel_outputs = jnp.transpose(mel_raw, (1, 0, 2)).reshape(B, n_steps * r, mel_dim)
    attn_scores = jnp.transpose(attn_raw, (1, 0, 2))                 # (B, n_steps, T_enc)
    stop_tokens = jnp.repeat(jnp.transpose(stop_raw[:, :, 0]), r, axis=1)  # (B, T_dec)
    return mel_outputs, stop_tokens, attn_scores


def init_decoder_params(key, hp, encoder_output_dim):
    mel_dim, r = hp["mel_dim"], hp["r"]
    p1, p2 = hp["prenet_dims"]
    A = hp["attention_rnn_units"]
    Dd = hp["decoder_rnn_units"]
    ad = hp["attention_dim"]
    nf = hp["attention_location_filters"]
    ks = hp["attention_location_kernel_size"]
    D = encoder_output_dim

    shapes = {
        "pre_w1": (mel_dim, p1), "pre_b1": (1, p1),
        "pre_w2": (p1, p2), "pre_b2": (1, p2),
        "arnn_wx": (p2, 4 * A), "arnn_wc": (D, 4 * A),
        "arnn_wh": (A, 4 * A), "arnn_b": (1, 4 * A),
        "mem_w": (D, ad), "query_w": (A, ad),
        "loc_conv_w": (ks, nf), "loc_dense_w": (nf, ad), "attn_v": (1, ad),
        "drnn_wh_in": (A, 4 * Dd), "drnn_wc_in": (D, 4 * Dd),
        "drnn_whh": (Dd, 4 * Dd), "drnn_b": (1, 4 * Dd),
        "mel_wh": (Dd, r * mel_dim), "mel_wc": (D, r * mel_dim),
        "mel_b": (1, r * mel_dim),
        "stop_wh": (Dd, 1), "stop_wc": (D, 1), "stop_b": (1, 1),
    }
    keys = jax.random.split(key, len(shapes))
    params = {}
    for (name, shape), k in zip(shapes.items(), keys):
        scale = 1.0 / float(shape[0]) ** 0.5
        params[name] = scale * jax.random.normal(k, shape, jnp.float32)
    return params


def decoder_reference(hp, params, encoder_outputs, mel_inputs, memory_lengths=None):
    """Pure-JAX reference with identical math (used for the correctness check)."""
    B, T_enc, D_enc = encoder_outputs.shape
    r, mel_dim = hp["r"], hp["mel_dim"]
    n_steps = mel_inputs.shape[1] // r
    A = hp["attention_rnn_units"]
    Dd = hp["decoder_rnn_units"]
    ks = params["loc_conv_w"].shape[0]
    pad = (ks - 1) // 2

    pm = encoder_outputs @ params["mem_w"]
    if memory_lengths is None:
        mask = jnp.zeros((B, T_enc), jnp.float32)
    else:
        pos = jnp.arange(T_enc)[None, :]
        mask = jnp.where(pos < memory_lengths[:, None], 0.0, -1e9).astype(jnp.float32)

    ah = jnp.zeros((B, A), jnp.float32)
    ac = jnp.zeros((B, A), jnp.float32)
    dh = jnp.zeros((B, Dd), jnp.float32)
    dc = jnp.zeros((B, Dd), jnp.float32)
    ctx = jnp.zeros((B, D_enc), jnp.float32)
    cw = jnp.zeros((B, T_enc), jnp.float32)
    cur = jnp.zeros((B, mel_dim), jnp.float32)

    stencil = params["loc_conv_w"] @ params["loc_dense_w"]

    mel_outs, attns, stops = [], [], []
    for step in range(n_steps):
        if step > 0:
            cur = mel_inputs[:, step * r - 1, :]
        h = jnp.maximum(cur @ params["pre_w1"] + params["pre_b1"], 0.0)
        h = jnp.maximum(h @ params["pre_w2"] + params["pre_b2"], 0.0)

        g = (h @ params["arnn_wx"] + ctx @ params["arnn_wc"]
             + ah @ params["arnn_wh"] + params["arnn_b"])
        ac = _sigmoid(g[:, A:2 * A]) * ac + _sigmoid(g[:, :A]) * jnp.tanh(g[:, 2 * A:3 * A])
        ah = _sigmoid(g[:, 3 * A:]) * jnp.tanh(ac)

        q = ah @ params["query_w"]
        cw_pad = jnp.pad(cw, ((0, 0), (pad, pad)))
        loc = sum(cw_pad[:, k:k + T_enc, None] * stencil[k][None, None, :]
                  for k in range(ks))
        e = jnp.tanh(q[:, None, :] + pm + loc)
        en = jnp.sum(e * params["attn_v"][None, :, :], axis=-1) + mask
        align = jax.nn.softmax(en, axis=-1)
        ctx = jnp.sum(align[:, :, None] * encoder_outputs, axis=1)
        cw = cw + align

        g = (ah @ params["drnn_wh_in"] + ctx @ params["drnn_wc_in"]
             + dh @ params["drnn_whh"] + params["drnn_b"])
        dc = _sigmoid(g[:, Dd:2 * Dd]) * dc + _sigmoid(g[:, :Dd]) * jnp.tanh(g[:, 2 * Dd:3 * Dd])
        dh = _sigmoid(g[:, 3 * Dd:]) * jnp.tanh(dc)

        mel = dh @ params["mel_wh"] + ctx @ params["mel_wc"] + params["mel_b"]
        stop = _sigmoid(dh @ params["stop_wh"] + ctx @ params["stop_wc"] + params["stop_b"])

        mel_outs.append(mel.reshape(B, r, mel_dim))
        attns.append(align[:, None, :])
        stops.extend([stop] * r)

    return (jnp.concatenate(mel_outs, axis=1),
            jnp.concatenate(stops, axis=1),
            jnp.concatenate(attns, axis=1))


if __name__ == "__main__":
    hp = dict(mel_dim=8, r=2, prenet_dims=(32, 16),
              attention_rnn_units=32, decoder_rnn_units=32,
              attention_dim=16, attention_location_filters=4,
              attention_location_kernel_size=5)
    B, T_enc, D_enc = 2, 16, 32
    T_dec = 8                              # mel frames -> 4 decoder steps of r=2

    key = jax.random.PRNGKey(0)
    kp, ke, km = jax.random.split(key, 3)
    params = init_decoder_params(kp, hp, D_enc)
    encoder_outputs = jax.random.normal(ke, (B, T_enc, D_enc), jnp.float32)
    mel_inputs = jax.random.normal(km, (B, T_dec, hp["mel_dim"]), jnp.float32)
    memory_lengths = jnp.array([T_enc, T_enc - 4], jnp.int32)

    mel, stop, attn = tacotron2_decoder_forward(
        hp, params, encoder_outputs, mel_inputs, memory_lengths)
    jax.block_until_ready((mel, stop, attn))

    assert mel.shape == (B, T_dec, hp["mel_dim"])
    assert stop.shape == (B, T_dec)
    assert attn.shape == (B, T_dec // hp["r"], T_enc)

    # Pure-JAX reference at highest matmul precision; tolerance allows for MXU
    # default-precision differences inside the kernel.
    with jax.default_matmul_precision("highest"):
        mel_ref, stop_ref, attn_ref = decoder_reference(
            hp, params, encoder_outputs, mel_inputs, memory_lengths)
    assert jnp.allclose(mel, mel_ref, rtol=2e-2, atol=2e-2), \
        float(jnp.max(jnp.abs(mel - mel_ref)))
    assert jnp.allclose(stop, stop_ref, rtol=2e-2, atol=2e-2), \
        float(jnp.max(jnp.abs(stop - stop_ref)))
    assert jnp.allclose(attn, attn_ref, rtol=2e-2, atol=2e-2), \
        float(jnp.max(jnp.abs(attn - attn_ref)))

    print("KERNEL_OK")
</pallas_src>

<mosaic_0001>
module attributes {stable_mosaic.version = 11 : i64} {
  func.func @_decoder_step_kernel(%arg0: i32, %arg1: memref<1x2x8xf32, #tpu.memory_space<vmem>>, %arg2: memref<2x16x32xf32, #tpu.memory_space<vmem>>, %arg3: memref<2x16xf32, #tpu.memory_space<vmem>>, %arg4: memref<8x32xf32, #tpu.memory_space<vmem>>, %arg5: memref<1x32xf32, #tpu.memory_space<vmem>>, %arg6: memref<32x16xf32, #tpu.memory_space<vmem>>, %arg7: memref<1x16xf32, #tpu.memory_space<vmem>>, %arg8: memref<16x128xf32, #tpu.memory_space<vmem>>, %arg9: memref<32x128xf32, #tpu.memory_space<vmem>>, %arg10: memref<32x128xf32, #tpu.memory_space<vmem>>, %arg11: memref<1x128xf32, #tpu.memory_space<vmem>>, %arg12: memref<32x16xf32, #tpu.memory_space<vmem>>, %arg13: memref<32x16xf32, #tpu.memory_space<vmem>>, %arg14: memref<5x4xf32, #tpu.memory_space<vmem>>, %arg15: memref<4x16xf32, #tpu.memory_space<vmem>>, %arg16: memref<1x16xf32, #tpu.memory_space<vmem>>, %arg17: memref<32x128xf32, #tpu.memory_space<vmem>>, %arg18: memref<32x128xf32, #tpu.memory_space<vmem>>, %arg19: memref<32x128xf32, #tpu.memory_space<vmem>>, %arg20: memref<1x128xf32, #tpu.memory_space<vmem>>, %arg21: memref<32x16xf32, #tpu.memory_space<vmem>>, %arg22: memref<32x16xf32, #tpu.memory_space<vmem>>, %arg23: memref<1x16xf32, #tpu.memory_space<vmem>>, %arg24: memref<32x1xf32, #tpu.memory_space<vmem>>, %arg25: memref<32x1xf32, #tpu.memory_space<vmem>>, %arg26: memref<1x1xf32, #tpu.memory_space<vmem>>, %arg27: memref<1x2x16xf32, #tpu.memory_space<vmem>>, %arg28: memref<1x2x16xf32, #tpu.memory_space<vmem>>, %arg29: memref<1x2x1xf32, #tpu.memory_space<vmem>>, %arg30: memref<2x16x16xf32, #tpu.memory_space<vmem>>, %arg31: memref<2x32xf32, #tpu.memory_space<vmem>>, %arg32: memref<2x32xf32, #tpu.memory_space<vmem>>, %arg33: memref<2x32xf32, #tpu.memory_space<vmem>>, %arg34: memref<2x32xf32, #tpu.memory_space<vmem>>, %arg35: memref<2x32xf32, #tpu.memory_space<vmem>>, %arg36: memref<2x16xf32, #tpu.memory_space<vmem>>) attributes {dimension_semantics = [#tpu.dimension_semantics<arbitrary>], iteration_bounds = array<i64: 4>, scalar_prefetch = 0 : i64, scratch_operands = 7 : i64, tpu.core_type = #tpu.core_type<tc>, window_params = [{transform_indices = @transform_0, window_bounds = array<i64: 1, 2, 8>}, {pipeline_mode = #tpu.pipeline_mode<synchronous>, transform_indices = @transform_1, window_bounds = array<i64: 2, 16, 32>}, {pipeline_mode = #tpu.pipeline_mode<synchronous>, transform_indices = @transform_2, window_bounds = array<i64: 2, 16>}, {pipeline_mode = #tpu.pipeline_mode<synchronous>, transform_indices = @transform_3, window_bounds = array<i64: 8, 32>}, {pipeline_mode = #tpu.pipeline_mode<synchronous>, transform_indices = @transform_4, window_bounds = array<i64: 1, 32>}, {pipeline_mode = #tpu.pipeline_mode<synchronous>, transform_indices = @transform_5, window_bounds = array<i64: 32, 16>}, {pipeline_mode = #tpu.pipeline_mode<synchronous>, transform_indices = @transform_6, window_bounds = array<i64: 1, 16>}, {pipeline_mode = #tpu.pipeline_mode<synchronous>, transform_indices = @transform_7, window_bounds = array<i64: 16, 128>}, {pipeline_mode = #tpu.pipeline_mode<synchronous>, transform_indices = @transform_8, window_bounds = array<i64: 32, 128>}, {pipeline_mode = #tpu.pipeline_mode<synchronous>, transform_indices = @transform_9, window_bounds = array<i64: 32, 128>}, {pipeline_mode = #tpu.pipeline_mode<synchronous>, transform_indices = @transform_10, window_bounds = array<i64: 1, 128>}, {pipeline_mode = #tpu.pipeline_mode<synchronous>, transform_indices = @transform_11, window_bounds = array<i64: 32, 16>}, {pipeline_mode = #tpu.pipeline_mode<synchronous>, transform_indices = @transform_12, window_bounds = array<i64: 32, 16>}, {pipeline_mode = #tpu.pipeline_mode<synchronous>, transform_indices = @transform_13, window_bounds = array<i64: 5, 4>}, {pipeline_mode = #tpu.pipeline_mode<synchronous>, transform_indices = @transform_14, window_bounds = array<i64: 4, 16>}, {pipeline_mode = #tpu.pipeline_mode<synchronous>, transform_indices = @transform_15, window_bounds = array<i64: 1, 16>}, {pipeline_mode = #tpu.pipeline_mode<synchronous>, transform_indices = @transform_16, window_bounds = array<i64: 32, 128>}, {pipeline_mode = #tpu.pipeline_mode<synchronous>, transform_indices = @transform_17, window_bounds = array<i64: 32, 128>}, {pipeline_mode = #tpu.pipeline_mode<synchronous>, transform_indices = @transform_18, window_bounds = array<i64: 32, 128>}, {pipeline_mode = #tpu.pipeline_mode<synchronous>, transform_indices = @transform_19, window_bounds = array<i64: 1, 128>}, {pipeline_mode = #tpu.pipeline_mode<synchronous>, transform_indices = @transform_20, window_bounds = array<i64: 32, 16>}, {pipeline_mode = #tpu.pipeline_mode<synchronous>, transform_indices = @transform_21, window_bounds = array<i64: 32, 16>}, {pipeline_mode = #tpu.pipeline_mode<synchronous>, transform_indices = @transform_22, window_bounds = array<i64: 1, 16>}, {pipeline_mode = #tpu.pipeline_mode<synchronous>, transform_indices = @transform_23, window_bounds = array<i64: 32, 1>}, {pipeline_mode = #tpu.pipeline_mode<synchronous>, transform_indices = @transform_24, window_bounds = array<i64: 32, 1>}, {pipeline_mode = #tpu.pipeline_mode<synchronous>, transform_indices = @transform_25, window_bounds = array<i64: 1, 1>}, {transform_indices = @transform_26, window_bounds = array<i64: 1, 2, 16>}, {transform_indices = @transform_27, window_bounds = array<i64: 1, 2, 16>}, {transform_indices = @transform_28, window_bounds = array<i64: 1, 2, 1>}]} {
    %c0_i32 = arith.constant 0 : i32
    %0 = arith.cmpi eq, %arg0, %c0_i32 : i32
    %1 = arith.extui %0 : i1 to i32
    %c0_i32_0 = arith.constant 0 : i32
    %2 = arith.cmpi ne, %1, %c0_i32_0 : i32
    scf.if %2 {
      %cst_130 = arith.constant 0.000000e+00 : f32
      %228 = vector.broadcast %cst_130 : f32 to vector<2x32xf32>
      %c0_131 = arith.constant 0 : index
      %c0_132 = arith.constant 0 : index
      %229 = vector.load %arg31[%c0_131, %c0_132] : memref<2x32xf32, #tpu.memory_space<vmem>>, vector<2x32xf32>
      tpu.vector_store %arg31[%c0_131, %c0_132], %228 {strides = array<i32>} : memref<2x32xf32, #tpu.memory_space<vmem>>, vector<2x32xf32>,
      %cst_133 = arith.constant 0.000000e+00 : f32
      %230 = vector.broadcast %cst_133 : f32 to vector<2x32xf32>
      %c0_134 = arith.constant 0 : index
      %c0_135 = arith.constant 0 : index
      %231 = vector.load %arg32[%c0_134, %c0_135] : memref<2x32xf32, #tpu.memory_space<vmem>>, vector<2x32xf32>
      tpu.vector_store %arg32[%c0_134, %c0_135], %230 {strides = array<i32>} : memref<2x32xf32, #tpu.memory_space<vmem>>, vector<2x32xf32>,
      %cst_136 = arith.constant 0.000000e+00 : f32
      %232 = vector.broadcast %cst_136 : f32 to vector<2x32xf32>
      %c0_137 = arith.constant 0 : index
      %c0_138 = arith.constant 0 : index
      %233 = vector.load %arg33[%c0_137, %c0_138] : memref<2x32xf32, #tpu.memory_space<vmem>>, vector<2x32xf32>
      tpu.vector_store %arg33[%c0_137, %c0_138], %232 {strides = array<i32>} : memref<2x32xf32, #tpu.memory_space<vmem>>, vector<2x32xf32>,
      %cst_139 = arith.constant 0.000000e+00 : f32
      %234 = vector.broadcast %cst_139 : f32 to vector<2x32xf32>
      %c0_140 = arith.constant 0 : index
      %c0_141 = arith.constant 0 : index
      %235 = vector.load %arg34[%c0_140, %c0_141] : memref<2x32xf32, #tpu.memory_space<vmem>>, vector<2x32xf32>
      tpu.vector_store %arg34[%c0_140, %c0_141], %234 {strides = array<i32>} : memref<2x32xf32, #tpu.memory_space<vmem>>, vector<2x32xf32>,
      %cst_142 = arith.constant 0.000000e+00 : f32
      %236 = vector.broadcast %cst_142 : f32 to vector<2x32xf32>
      %c0_143 = arith.constant 0 : index
      %c0_144 = arith.constant 0 : index
      %237 = vector.load %arg35[%c0_143, %c0_144] : memref<2x32xf32, #tpu.memory_space<vmem>>, vector<2x32xf32>
      tpu.vector_store %arg35[%c0_143, %c0_144], %236 {strides = array<i32>} : memref<2x32xf32, #tpu.memory_space<vmem>>, vector<2x32xf32>,
      %cst_145 = arith.constant 0.000000e+00 : f32
      %238 = vector.broadcast %cst_145 : f32 to vector<2x16xf32>
      %c0_146 = arith.constant 0 : index
      %c0_147 = arith.constant 0 : index
      %239 = vector.load %arg36[%c0_146, %c0_147] : memref<2x16xf32, #tpu.memory_space<vmem>>, vector<2x16xf32>
      tpu.vector_store %arg36[%c0_146, %c0_147], %238 {strides = array<i32>} : memref<2x16xf32, #tpu.memory_space<vmem>>, vector<2x16xf32>,
      %c0_148 = arith.constant 0 : index
      %c0_149 = arith.constant 0 : index
      %c0_150 = arith.constant 0 : index
      %240 = vector.load %arg2[%c0_148, %c0_149, %c0_150] : memref<2x16x32xf32, #tpu.memory_space<vmem>>, vector<2x16x32xf32>
      %241 = vector.shape_cast %240 : vector<2x16x32xf32> to vector<32x32xf32>
      %c0_151 = arith.constant 0 : index
      %c0_152 = arith.constant 0 : index
      %242 = vector.load %arg12[%c0_151, %c0_152] : memref<32x16xf32, #tpu.memory_space<vmem>>, vector<32x16xf32>
      %cst_153 = arith.constant dense<0.000000e+00> : vector<32x16xf32>
      %243 = tpu.matmul %241, %242, %cst_153 {dimension_numbers = #tpu.dot_dimension_numbers<[1], [0], [0], [1], [0, 0, 1, 1], [], []>} : vector<32x32xf32>, vector<32x16xf32>, vector<32x16xf32> -> vector<32x16xf32>
      %244 = vector.shape_cast %243 : vector<32x16xf32> to vector<2x16x16xf32>
      %c0_154 = arith.constant 0 : index
      %c0_155 = arith.constant 0 : index
      %c0_156 = arith.constant 0 : index
      %245 = vector.load %arg30[%c0_154, %c0_155, %c0_156] : memref<2x16x16xf32, #tpu.memory_space<vmem>>, vector<2x16x16xf32>
      tpu.vector_store %arg30[%c0_154, %c0_155, %c0_156], %244 {strides = array<i32>} : memref<2x16x16xf32, #tpu.memory_space<vmem>>, vector<2x16x16xf32>,
    } else {
    }
    %c0 = arith.constant 0 : index
    %c0_1 = arith.constant 0 : index
    %c0_2 = arith.constant 0 : index
    %3 = vector.load %arg1[%c0, %c0_1, %c0_2] : memref<1x2x8xf32, #tpu.memory_space<vmem>>, vector<1x2x8xf32>
    %4 = vector.shape_cast %3 : vector<1x2x8xf32> to vector<2x8xf32>
    %c0_3 = arith.constant 0 : index
    %c0_4 = arith.constant 0 : index
    %5 = vector.load %arg4[%c0_3, %c0_4] : memref<8x32xf32, #tpu.memory_space<vmem>>, vector<8x32xf32>
    %cst = arith.constant dense<0.000000e+00> : vector<2x32xf32>
    %6 = tpu.matmul %4, %5, %cst {dimension_numbers = #tpu.dot_dimension_numbers<[1], [0], [0], [1], [0, 0, 1, 1], [], []>} : vector<2x8xf32>, vector<8x32xf32>, vector<2x32xf32> -> vector<2x32xf32>
    %c0_5 = arith.constant 0 : index
    %c0_6 = arith.constant 0 : index
    %7 = vector.load %arg5[%c0_5, %c0_6] : memref<1x32xf32, #tpu.memory_space<vmem>>, vector<1x32xf32>
    %8 = vector.broadcast %7 : vector<1x32xf32> to vector<2x32xf32>
    %9 = arith.addf %6, %8 : vector<2x32xf32>
    %cst_7 = arith.constant 0.000000e+00 : f32
    %10 = vector.broadcast %cst_7 : f32 to vector<2x32xf32>
    %11 = arith.maximumf %9, %10 : vector<2x32xf32>
    %c0_8 = arith.constant 0 : index
    %c0_9 = arith.constant 0 : index
    %12 = vector.load %arg6[%c0_8, %c0_9] : memref<32x16xf32, #tpu.memory_space<vmem>>, vector<32x16xf32>
    %cst_10 = arith.constant dense<0.000000e+00> : vector<2x16xf32>
    %13 = tpu.matmul %11, %12, %cst_10 {dimension_numbers = #tpu.dot_dimension_numbers<[1], [0], [0], [1], [0, 0, 1, 1], [], []>} : vector<2x32xf32>, vector<32x16xf32>, vector<2x16xf32> -> vector<2x16xf32>
    %c0_11 = arith.constant 0 : index
    %c0_12 = arith.constant 0 : index
    %14 = vector.load %arg7[%c0_11, %c0_12] : memref<1x16xf32, #tpu.memory_space<vmem>>, vector<1x16xf32>
    %15 = vector.broadcast %14 : vector<1x16xf32> to vector<2x16xf32>
    %16 = arith.addf %13, %15 : vector<2x16xf32>
    %cst_13 = arith.constant 0.000000e+00 : f32
    %17 = vector.broadcast %cst_13 : f32 to vector<2x16xf32>
    %18 = arith.maximumf %16, %17 : vector<2x16xf32>
    %c0_14 = arith.constant 0 : index
    %c0_15 = arith.constant 0 : index
    %19 = vector.load %arg35[%c0_14, %c0_15] : memref<2x32xf32, #tpu.memory_space<vmem>>, vector<2x32xf32>
    %c0_16 = arith.constant 0 : index
    %c0_17 = arith.constant 0 : index
    %20 = vector.load %arg8[%c0_16, %c0_17] : memref<16x128xf32, #tpu.memory_space<vmem>>, vector<16x128xf32>
    %cst_18 = arith.constant dense<0.000000e+00> : vector<2x128xf32>
    %21 = tpu.matmul %18, %20, %cst_18 {dimension_numbers = #tpu.dot_dimension_numbers<[1], [0], [0], [1], [0, 0, 1, 1], [], []>} : vector<2x16xf32>, vector<16x128xf32>, vector<2x128xf32> -> vector<2x128xf32>
    %c0_19 = arith.constant 0 : index
    %c0_20 = arith.constant 0 : index
    %22 = vector.load %arg9[%c0_19, %c0_20] : memref<32x128xf32, #tpu.memory_space<vmem>>, vector<32x128xf32>
    %cst_21 = arith.constant dense<0.000000e+00> : vector<2x128xf32>
    %23 = tpu.matmul %19, %22, %cst_21 {dimension_numbers = #tpu.dot_dimension_numbers<[1], [0], [0], [1], [0, 0, 1, 1], [], []>} : vector<2x32xf32>, vector<32x128xf32>, vector<2x128xf32> -> vector<2x128xf32>
    %24 = arith.addf %21, %23 : vector<2x128xf32>
    %c0_22 = arith.constant 0 : index
    %c0_23 = arith.constant 0 : index
    %25 = vector.load %arg31[%c0_22, %c0_23] : memref<2x32xf32, #tpu.memory_space<vmem>>, vector<2x32xf32>
    %c0_24 = arith.constant 0 : index
    %c0_25 = arith.constant 0 : index
    %26 = vector.load %arg10[%c0_24, %c0_25] : memref<32x128xf32, #tpu.memory_space<vmem>>, vector<32x128xf32>
    %cst_26 = arith.constant dense<0.000000e+00> : vector<2x128xf32>
    %27 = tpu.matmul %25, %26, %cst_26 {dimension_numbers = #tpu.dot_dimension_numbers<[1], [0], [0], [1], [0, 0, 1, 1], [], []>} : vector<2x32xf32>, vector<32x128xf32>, vector<2x128xf32> -> vector<2x128xf32>
    %28 = arith.addf %24, %27 : vector<2x128xf32>
    %c0_27 = arith.constant 0 : index
    %c0_28 = arith.constant 0 : index
    %29 = vector.load %arg11[%c0_27, %c0_28] : memref<1x128xf32, #tpu.memory_space<vmem>>, vector<1x128xf32>
    %30 = vector.broadcast %29 : vector<1x128xf32> to vector<2x128xf32>
    %31 = arith.addf %28, %30 : vector<2x128xf32>
    %32 = vector.extract_strided_slice %31 {offsets = [0, 0], sizes = [2, 32], strides = [1, 1]} : vector<2x128xf32> to vector<2x32xf32>
    %cst_29 = arith.constant 0.000000e+00 : f32
    %33 = vector.broadcast %cst_29 : f32 to vector<2x32xf32>
    %34 = arith.subf %33, %32 : vector<2x32xf32>
    %35 = math.exp %34 : vector<2x32xf32>
    %cst_30 = arith.constant 1.000000e+00 : f32
    %36 = vector.broadcast %cst_30 : f32 to vector<2x32xf32>
    %37 = arith.addf %36, %35 : vector<2x32xf32>
    %cst_31 = arith.constant 1.000000e+00 : f32
    %38 = vector.broadcast %cst_31 : f32 to vector<2x32xf32>
    %39 = arith.divf %38, %37 : vector<2x32xf32>
    %40 = vector.extract_strided_slice %31 {offsets = [0, 32], sizes = [2, 32], strides = [1, 1]} : vector<2x128xf32> to vector<2x32xf32>
    %cst_32 = arith.constant 0.000000e+00 : f32
    %41 = vector.broadcast %cst_32 : f32 to vector<2x32xf32>
    %42 = arith.subf %41, %40 : vector<2x32xf32>
    %43 = math.exp %42 : vector<2x32xf32>
    %cst_33 = arith.constant 1.000000e+00 : f32
    %44 = vector.broadcast %cst_33 : f32 to vector<2x32xf32>
    %45 = arith.addf %44, %43 : vector<2x32xf32>
    %cst_34 = arith.constant 1.000000e+00 : f32
    %46 = vector.broadcast %cst_34 : f32 to vector<2x32xf32>
    %47 = arith.divf %46, %45 : vector<2x32xf32>
    %48 = vector.extract_strided_slice %31 {offsets = [0, 64], sizes = [2, 32], strides = [1, 1]} : vector<2x128xf32> to vector<2x32xf32>
    %49 = math.tanh %48 : vector<2x32xf32>
    %50 = vector.extract_strided_slice %31 {offsets = [0, 96], sizes = [2, 32], strides = [1, 1]} : vector<2x128xf32> to vector<2x32xf32>
    %cst_35 = arith.constant 0.000000e+00 : f32
    %51 = vector.broadcast %cst_35 : f32 to vector<2x32xf32>
    %52 = arith.subf %51, %50 : vector<2x32xf32>
    %53 = math.exp %52 : vector<2x32xf32>
    %cst_36 = arith.constant 1.000000e+00 : f32
    %54 = vector.broadcast %cst_36 : f32 to vector<2x32xf32>
    %55 = arith.addf %54, %53 : vector<2x32xf32>
    %cst_37 = arith.constant 1.000000e+00 : f32
    %56 = vector.broadcast %cst_37 : f32 to vector<2x32xf32>
    %57 = arith.divf %56, %55 : vector<2x32xf32>
    %c0_38 = arith.constant 0 : index
    %c0_39 = arith.constant 0 : index
    %58 = vector.load %arg32[%c0_38, %c0_39] : memref<2x32xf32, #tpu.memory_space<vmem>>, vector<2x32xf32>
    %59 = arith.mulf %47, %58 : vector<2x32xf32>
    %60 = arith.mulf %39, %49 : vector<2x32xf32>
    %61 = arith.addf %59, %60 : vector<2x32xf32>
    %62 = math.tanh %61 : vector<2x32xf32>
    %63 = arith.mulf %57, %62 : vector<2x32xf32>
    %c0_40 = arith.constant 0 : index
    %c0_41 = arith.constant 0 : index
    %64 = vector.load %arg31[%c0_40, %c0_41] : memref<2x32xf32, #tpu.memory_space<vmem>>, vector<2x32xf32>
    tpu.vector_store %arg31[%c0_40, %c0_41], %63 {strides = array<i32>} : memref<2x32xf32, #tpu.memory_space<vmem>>, vector<2x32xf32>,
    %c0_42 = arith.constant 0 : index
    %c0_43 = arith.constant 0 : index
    %65 = vector.load %arg32[%c0_42, %c0_43] : memref<2x32xf32, #tpu.memory_space<vmem>>, vector<2x32xf32>
    tpu.vector_store %arg32[%c0_42, %c0_43], %61 {strides = array<i32>} : memref<2x32xf32, #tpu.memory_space<vmem>>, vector<2x32xf32>,
    %c0_44 = arith.constant 0 : index
    %c0_45 = arith.constant 0 : index
    %66 = vector.load %arg13[%c0_44, %c0_45] : memref<32x16xf32, #tpu.memory_space<vmem>>, vector<32x16xf32>
    %cst_46 = arith.constant dense<0.000000e+00> : vector<2x16xf32>
    %67 = tpu.matmul %63, %66, %cst_46 {dimension_numbers = #tpu.dot_dimension_numbers<[1], [0], [0], [1], [0, 0, 1, 1], [], []>} : vector<2x32xf32>, vector<32x16xf32>, vector<2x16xf32> -> vector<2x16xf32>
    %c0_47 = arith.constant 0 : index
    %c0_48 = arith.constant 0 : index
    %68 = vector.load %arg36[%c0_47, %c0_48] : memref<2x16xf32, #tpu.memory_space<vmem>>, vector<2x16xf32>
    %cst_49 = arith.constant 0.000000e+00 : f32
    %69 = vector.broadcast %cst_49 : f32 to vector<2x2xf32>
    %70 = tpu.concatenate %69, %68, %69 in 1 : vector<2x2xf32>, vector<2x16xf32>, vector<2x2xf32> -> vector<2x20xf32>
    %c0_50 = arith.constant 0 : index
    %c0_51 = arith.constant 0 : index
    %71 = vector.load %arg14[%c0_50, %c0_51] : memref<5x4xf32, #tpu.memory_space<vmem>>, vector<5x4xf32>
    %c0_52 = arith.constant 0 : index
    %c0_53 = arith.constant 0 : index
    %72 = vector.load %arg15[%c0_52, %c0_53] : memref<4x16xf32, #tpu.memory_space<vmem>>, vector<4x16xf32>
    %cst_54 = arith.constant dense<0.000000e+00> : vector<5x16xf32>
    %73 = tpu.matmul %71, %72, %cst_54 {dimension_numbers = #tpu.dot_dimension_numbers<[1], [0], [0], [1], [0, 0, 1, 1], [], []>} : vector<5x4xf32>, vector<4x16xf32>, vector<5x16xf32> -> vector<5x16xf32>
    %cst_55 = arith.constant 0.000000e+00 : f32
    %74 = vector.broadcast %cst_55 : f32 to vector<2x16x16xf32>
    %75 = vector.extract_strided_slice %70 {offsets = [0, 0], sizes = [2, 16], strides = [1, 1]} : vector<2x20xf32> to vector<2x16xf32>
    %76 = vector.shape_cast %75 : vector<2x16xf32> to vector<2x16x1xf32>
    %77 = vector.extract_strided_slice %73 {offsets = [0, 0], sizes = [1, 16], strides = [1, 1]} : vector<5x16xf32> to vector<1x16xf32>
    %78 = vector.shape_cast %77 : vector<1x16xf32> to vector<16xf32>
    %79 = vector.shape_cast %78 : vector<16xf32> to vector<1x1x16xf32>
    %80 = vector.broadcast %76 : vector<2x16x1xf32> to vector<2x16x16xf32>
    %81 = vector.broadcast %79 : vector<1x1x16xf32> to vector<2x16x16xf32>
    %82 = arith.mulf %80, %81 : vector<2x16x16xf32>
    %83 = arith.addf %74, %82 : vector<2x16x16xf32>
    %84 = vector.extract_strided_slice %70 {offsets = [0, 1], sizes = [2, 16], strides = [1, 1]} : vector<2x20xf32> to vector<2x16xf32>
    %85 = vector.shape_cast %84 : vector<2x16xf32> to vector<2x16x1xf32>
    %86 = vector.extract_strided_slice %73 {offsets = [1, 0], sizes = [1, 16], strides = [1, 1]} : vector<5x16xf32> to vector<1x16xf32>
    %87 = vector.shape_cast %86 : vector<1x16xf32> to vector<16xf32>
    %88 = vector.shape_cast %87 : vector<16xf32> to vector<1x1x16xf32>
    %89 = vector.broadcast %85 : vector<2x16x1xf32> to vector<2x16x16xf32>
    %90 = vector.broadcast %88 : vector<1x1x16xf32> to vector<2x16x16xf32>
    %91 = arith.mulf %89, %90 : vector<2x16x16xf32>
    %92 = arith.addf %83, %91 : vector<2x16x16xf32>
    %93 = vector.extract_strided_slice %70 {offsets = [0, 2], sizes = [2, 16], strides = [1, 1]} : vector<2x20xf32> to vector<2x16xf32>
    %94 = vector.shape_cast %93 : vector<2x16xf32> to vector<2x16x1xf32>
    %95 = vector.extract_strided_slice %73 {offsets = [2, 0], sizes = [1, 16], strides = [1, 1]} : vector<5x16xf32> to vector<1x16xf32>
    %96 = vector.shape_cast %95 : vector<1x16xf32> to vector<16xf32>
    %97 = vector.shape_cast %96 : vector<16xf32> to vector<1x1x16xf32>
    %98 = vector.broadcast %94 : vector<2x16x1xf32> to vector<2x16x16xf32>
    %99 = vector.broadcast %97 : vector<1x1x16xf32> to vector<2x16x16xf32>
    %100 = arith.mulf %98, %99 : vector<2x16x16xf32>
    %101 = arith.addf %92, %100 : vector<2x16x16xf32>
    %102 = vector.extract_strided_slice %70 {offsets = [0, 3], sizes = [2, 16], strides = [1, 1]} : vector<2x20xf32> to vector<2x16xf32>
    %103 = vector.shape_cast %102 : vector<2x16xf32> to vector<2x16x1xf32>
    %104 = vector.extract_strided_slice %73 {offsets = [3, 0], sizes = [1, 16], strides = [1, 1]} : vector<5x16xf32> to vector<1x16xf32>
    %105 = vector.shape_cast %104 : vector<1x16xf32> to vector<16xf32>
    %106 = vector.shape_cast %105 : vector<16xf32> to vector<1x1x16xf32>
    %107 = vector.broadcast %103 : vector<2x16x1xf32> to vector<2x16x16xf32>
    %108 = vector.broadcast %106 : vector<1x1x16xf32> to vector<2x16x16xf32>
    %109 = arith.mulf %107, %108 : vector<2x16x16xf32>
    %110 = arith.addf %101, %109 : vector<2x16x16xf32>
    %111 = vector.extract_strided_slice %70 {offsets = [0, 4], sizes = [2, 16], strides = [1, 1]} : vector<2x20xf32> to vector<2x16xf32>
    %112 = vector.shape_cast %111 : vector<2x16xf32> to vector<2x16x1xf32>
    %113 = vector.extract_strided_slice %73 {offsets = [4, 0], sizes = [1, 16], strides = [1, 1]} : vector<5x16xf32> to vector<1x16xf32>
    %114 = vector.shape_cast %113 : vector<1x16xf32> to vector<16xf32>
    %115 = vector.shape_cast %114 : vector<16xf32> to vector<1x1x16xf32>
    %116 = vector.broadcast %112 : vector<2x16x1xf32> to vector<2x16x16xf32>
    %117 = vector.broadcast %115 : vector<1x1x16xf32> to vector<2x16x16xf32>
    %118 = arith.mulf %116, %117 : vector<2x16x16xf32>
    %119 = arith.addf %110, %118 : vector<2x16x16xf32>
    %120 = vector.shape_cast %67 : vector<2x16xf32> to vector<2x1x16xf32>
    %c0_56 = arith.constant 0 : index
    %c0_57 = arith.constant 0 : index
    %c0_58 = arith.constant 0 : index
    %121 = vector.load %arg30[%c0_56, %c0_57, %c0_58] : memref<2x16x16xf32, #tpu.memory_space<vmem>>, vector<2x16x16xf32>
    %122 = vector.broadcast %120 : vector<2x1x16xf32> to vector<2x16x16xf32>
    %123 = arith.addf %122, %121 : vector<2x16x16xf32>
    %124 = arith.addf %123, %119 : vector<2x16x16xf32>
    %125 = math.tanh %124 : vector<2x16x16xf32>
    %c0_59 = arith.constant 0 : index
    %c0_60 = arith.constant 0 : index
    %126 = vector.load %arg16[%c0_59, %c0_60] : memref<1x16xf32, #tpu.memory_space<vmem>>, vector<1x16xf32>
    %127 = vector.shape_cast %126 : vector<1x16xf32> to vector<1x1x16xf32>
    %128 = vector.broadcast %127 : vector<1x1x16xf32> to vector<2x16x16xf32>
    %129 = arith.mulf %125, %128 : vector<2x16x16xf32>
    %cst_61 = arith.constant dense<0.000000e+00> : vector<2x16xf32>
    %130 = vector.multi_reduction <add>, %129, %cst_61 [2] : vector<2x16x16xf32> to vector<2x16xf32>
    %c0_62 = arith.constant 0 : index
    %c0_63 = arith.constant 0 : index
    %131 = vector.load %arg3[%c0_62, %c0_63] : memref<2x16xf32, #tpu.memory_space<vmem>>, vector<2x16xf32>
    %132 = arith.addf %130, %131 : vector<2x16xf32>
    %cst_64 = arith.constant dense<0xFF800000> : vector<2xf32>
    %133 = vector.multi_reduction <maximumf>, %132, %cst_64 [1] : vector<2x16xf32> to vector<2xf32>
    %134 = vector.shape_cast %133 : vector<2xf32> to vector<2x1xf32>
    %135 = vector.broadcast %134 : vector<2x1xf32> to vector<2x16xf32>
    %136 = arith.subf %132, %135 : vector<2x16xf32>
    %137 = math.exp %136 : vector<2x16xf32>
    %cst_65 = arith.constant dense<0.000000e+00> : vector<2xf32>
    %138 = vector.multi_reduction <add>, %137, %cst_65 [1] : vector<2x16xf32> to vector<2xf32>
    %139 = vector.shape_cast %138 : vector<2xf32> to vector<2x1xf32>
    %140 = vector.broadcast %139 : vector<2x1xf32> to vector<2x16xf32>
    %141 = arith.divf %137, %140 : vector<2x16xf32>
    %c0_66 = arith.constant 0 : index
    %c0_67 = arith.constant 0 : index
    %c0_68 = arith.constant 0 : index
    %142 = vector.load %arg2[%c0_66, %c0_67, %c0_68] : memref<2x16x32xf32, #tpu.memory_space<vmem>>, vector<2x16x32xf32>
    %143 = vector.shape_cast %141 : vector<2x16xf32> to vector<2x16x1xf32>
    %144 = vector.broadcast %143 : vector<2x16x1xf32> to vector<2x16x32xf32>
    %145 = arith.mulf %144, %142 : vector<2x16x32xf32>
    %cst_69 = arith.constant dense<0.000000e+00> : vector<2x32xf32>
    %146 = vector.multi_reduction <add>, %145, %cst_69 [1] : vector<2x16x32xf32> to vector<2x32xf32>
    %147 = arith.addf %68, %141 : vector<2x16xf32>
    %c0_70 = arith.constant 0 : index
    %c0_71 = arith.constant 0 : index
    %148 = vector.load %arg36[%c0_70, %c0_71] : memref<2x16xf32, #tpu.memory_space<vmem>>, vector<2x16xf32>
    tpu.vector_store %arg36[%c0_70, %c0_71], %147 {strides = array<i32>} : memref<2x16xf32, #tpu.memory_space<vmem>>, vector<2x16xf32>,
    %c0_72 = arith.constant 0 : index
    %c0_73 = arith.constant 0 : index
    %149 = vector.load %arg35[%c0_72, %c0_73] : memref<2x32xf32, #tpu.memory_space<vmem>>, vector<2x32xf32>
    tpu.vector_store %arg35[%c0_72, %c0_73], %146 {strides = array<i32>} : memref<2x32xf32, #tpu.memory_space<vmem>>, vector<2x32xf32>,
    %c0_74 = arith.constant 0 : index
    %c0_75 = arith.constant 0 : index
    %150 = vector.load %arg17[%c0_74, %c0_75] : memref<32x128xf32, #tpu.memory_space<vmem>>, vector<32x128xf32>
    %cst_76 = arith.constant dense<0.000000e+00> : vector<2x128xf32>
    %151 = tpu.matmul %63, %150, %cst_76 {dimension_numbers = #tpu.dot_dimension_numbers<[1], [0], [0], [1], [0, 0, 1, 1], [], []>} : vector<2x32xf32>, vector<32x128xf32>, vector<2x128xf32> -> vector<2x128xf32>
    %c0_77 = arith.constant 0 : index
    %c0_78 = arith.constant 0 : index
    %152 = vector.load %arg18[%c0_77, %c0_78] : memref<32x128xf32, #tpu.memory_space<vmem>>, vector<32x128xf32>
    %cst_79 = arith.constant dense<0.000000e+00> : vector<2x128xf32>
    %153 = tpu.matmul %146, %152, %cst_79 {dimension_numbers = #tpu.dot_dimension_numbers<[1], [0], [0], [1], [0, 0, 1, 1], [], []>} : vector<2x32xf32>, vector<32x128xf32>, vector<2x128xf32> -> vector<2x128xf32>
    %154 = arith.addf %151, %153 : vector<2x128xf32>
    %c0_80 = arith.constant 0 : index
    %c0_81 = arith.constant 0 : index
    %155 = vector.load %arg33[%c0_80, %c0_81] : memref<2x32xf32, #tpu.memory_space<vmem>>, vector<2x32xf32>
    %c0_82 = arith.constant 0 : index
    %c0_83 = arith.constant 0 : index
    %156 = vector.load %arg19[%c0_82, %c0_83] : memref<32x128xf32, #tpu.memory_space<vmem>>, vector<32x128xf32>
    %cst_84 = arith.constant dense<0.000000e+00> : vector<2x128xf32>
    %157 = tpu.matmul %155, %156, %cst_84 {dimension_numbers = #tpu.dot_dimension_numbers<[1], [0], [0], [1], [0, 0, 1, 1], [], []>} : vector<2x32xf32>, vector<32x128xf32>, vector<2x128xf32> -> vector<2x128xf32>
    %158 = arith.addf %154, %157 : vector<2x128xf32>
    %c0_85 = arith.constant 0 : index
    %c0_86 = arith.constant 0 : index
    %159 = vector.load %arg20[%c0_85, %c0_86] : memref<1x128xf32, #tpu.memory_space<vmem>>, vector<1x128xf32>
    %160 = vector.broadcast %159 : vector<1x128xf32> to vector<2x128xf32>
    %161 = arith.addf %158, %160 : vector<2x128xf32>
    %162 = vector.extract_strided_slice %161 {offsets = [0, 0], sizes = [2, 32], strides = [1, 1]} : vector<2x128xf32> to vector<2x32xf32>
    %cst_87 = arith.constant 0.000000e+00 : f32
    %163 = vector.broadcast %cst_87 : f32 to vector<2x32xf32>
    %164 = arith.subf %163, %162 : vector<2x32xf32>
    %165 = math.exp %164 : vector<2x32xf32>
    %cst_88 = arith.constant 1.000000e+00 : f32
    %166 = vector.broadcast %cst_88 : f32 to vector<2x32xf32>
    %167 = arith.addf %166, %165 : vector<2x32xf32>
    %cst_89 = arith.constant 1.000000e+00 : f32
    %168 = vector.broadcast %cst_89 : f32 to vector<2x32xf32>
    %169 = arith.divf %168, %167 : vector<2x32xf32>
    %170 = vector.extract_strided_slice %161 {offsets = [0, 32], sizes = [2, 32], strides = [1, 1]} : vector<2x128xf32> to vector<2x32xf32>
    %cst_90 = arith.constant 0.000000e+00 : f32
    %171 = vector.broadcast %cst_90 : f32 to vector<2x32xf32>
    %172 = arith.subf %171, %170 : vector<2x32xf32>
    %173 = math.exp %172 : vector<2x32xf32>
    %cst_91 = arith.constant 1.000000e+00 : f32
    %174 = vector.broadcast %cst_91 : f32 to vector<2x32xf32>
    %175 = arith.addf %174, %173 : vector<2x32xf32>
    %cst_92 = arith.constant 1.000000e+00 : f32
    %176 = vector.broadcast %cst_92 : f32 to vector<2x32xf32>
    %177 = arith.divf %176, %175 : vector<2x32xf32>
    %178 = vector.extract_strided_slice %161 {offsets = [0, 64], sizes = [2, 32], strides = [1, 1]} : vector<2x128xf32> to vector<2x32xf32>
    %179 = math.tanh %178 : vector<2x32xf32>
    %180 = vector.extract_strided_slice %161 {offsets = [0, 96], sizes = [2, 32], strides = [1, 1]} : vector<2x128xf32> to vector<2x32xf32>
    %cst_93 = arith.constant 0.000000e+00 : f32
    %181 = vector.broadcast %cst_93 : f32 to vector<2x32xf32>
    %182 = arith.subf %181, %180 : vector<2x32xf32>
    %183 = math.exp %182 : vector<2x32xf32>
    %cst_94 = arith.constant 1.000000e+00 : f32
    %184 = vector.broadcast %cst_94 : f32 to vector<2x32xf32>
    %185 = arith.addf %184, %183 : vector<2x32xf32>
    %cst_95 = arith.constant 1.000000e+00 : f32
    %186 = vector.broadcast %cst_95 : f32 to vector<2x32xf32>
    %187 = arith.divf %186, %185 : vector<2x32xf32>
    %c0_96 = arith.constant 0 : index
    %c0_97 = arith.constant 0 : index
    %188 = vector.load %arg34[%c0_96, %c0_97] : memref<2x32xf32, #tpu.memory_space<vmem>>, vector<2x32xf32>
    %189 = arith.mulf %177, %188 : vector<2x32xf32>
    %190 = arith.mulf %169, %179 : vector<2x32xf32>
    %191 = arith.addf %189, %190 : vector<2x32xf32>
    %192 = math.tanh %191 : vector<2x32xf32>
    %193 = arith.mulf %187, %192 : vector<2x32xf32>
    %c0_98 = arith.constant 0 : index
    %c0_99 = arith.constant 0 : index
    %194 = vector.load %arg33[%c0_98, %c0_99] : memref<2x32xf32, #tpu.memory_space<vmem>>, vector<2x32xf32>
    tpu.vector_store %arg33[%c0_98, %c0_99], %193 {strides = array<i32>} : memref<2x32xf32, #tpu.memory_space<vmem>>, vector<2x32xf32>,
    %c0_100 = arith.constant 0 : index
    %c0_101 = arith.constant 0 : index
    %195 = vector.load %arg34[%c0_100, %c0_101] : memref<2x32xf32, #tpu.memory_space<vmem>>, vector<2x32xf32>
    tpu.vector_store %arg34[%c0_100, %c0_101], %191 {strides = array<i32>} : memref<2x32xf32, #tpu.memory_space<vmem>>, vector<2x32xf32>,
    %c0_102 = arith.constant 0 : index
    %c0_103 = arith.constant 0 : index
    %196 = vector.load %arg21[%c0_102, %c0_103] : memref<32x16xf32, #tpu.memory_space<vmem>>, vector<32x16xf32>
    %cst_104 = arith.constant dense<0.000000e+00> : vector<2x16xf32>
    %197 = tpu.matmul %193, %196, %cst_104 {dimension_numbers = #tpu.dot_dimension_numbers<[1], [0], [0], [1], [0, 0, 1, 1], [], []>} : vector<2x32xf32>, vector<32x16xf32>, vector<2x16xf32> -> vector<2x16xf32>
    %c0_105 = arith.constant 0 : index
    %c0_106 = arith.constant 0 : index
    %198 = vector.load %arg22[%c0_105, %c0_106] : memref<32x16xf32, #tpu.memory_space<vmem>>, vector<32x16xf32>
    %cst_107 = arith.constant dense<0.000000e+00> : vector<2x16xf32>
    %199 = tpu.matmul %146, %198, %cst_107 {dimension_numbers = #tpu.dot_dimension_numbers<[1], [0], [0], [1], [0, 0, 1, 1], [], []>} : vector<2x32xf32>, vector<32x16xf32>, vector<2x16xf32> -> vector<2x16xf32>
    %200 = arith.addf %197, %199 : vector<2x16xf32>
    %c0_108 = arith.constant 0 : index
    %c0_109 = arith.constant 0 : index
    %201 = vector.load %arg23[%c0_108, %c0_109] : memref<1x16xf32, #tpu.memory_space<vmem>>, vector<1x16xf32>
    %202 = vector.broadcast %201 : vector<1x16xf32> to vector<2x16xf32>
    %203 = arith.addf %200, %202 : vector<2x16xf32>
    %c0_110 = arith.constant 0 : index
    %c0_111 = arith.constant 0 : index
    %204 = vector.load %arg24[%c0_110, %c0_111] : memref<32x1xf32, #tpu.memory_space<vmem>>, vector<32x1xf32>
    %cst_112 = arith.constant dense<0.000000e+00> : vector<2x1xf32>
    %205 = tpu.matmul %193, %204, %cst_112 {dimension_numbers = #tpu.dot_dimension_numbers<[1], [0], [0], [1], [0, 0, 1, 1], [], []>} : vector<2x32xf32>, vector<32x1xf32>, vector<2x1xf32> -> vector<2x1xf32>
    %c0_113 = arith.constant 0 : index
    %c0_114 = arith.constant 0 : index
    %206 = vector.load %arg25[%c0_113, %c0_114] : memref<32x1xf32, #tpu.memory_space<vmem>>, vector<32x1xf32>
    %cst_115 = arith.constant dense<0.000000e+00> : vector<2x1xf32>
    %207 = tpu.matmul %146, %206, %cst_115 {dimension_numbers = #tpu.dot_dimension_numbers<[1], [0], [0], [1], [0, 0, 1, 1], [], []>} : vector<2x32xf32>, vector<32x1xf32>, vector<2x1xf32> -> vector<2x1xf32>
    %208 = arith.addf %205, %207 : vector<2x1xf32>
    %c0_116 = arith.constant 0 : index
    %c0_117 = arith.constant 0 : index
    %209 = vector.load %arg26[%c0_116, %c0_117] : memref<1x1xf32, #tpu.memory_space<vmem>>, vector<1x1xf32>
    %210 = vector.broadcast %209 : vector<1x1xf32> to vector<2x1xf32>
    %211 = arith.addf %208, %210 : vector<2x1xf32>
    %cst_118 = arith.constant 0.000000e+00 : f32
    %212 = vector.broadcast %cst_118 : f32 to vector<2x1xf32>
    %213 = arith.subf %212, %211 : vector<2x1xf32>
    %214 = math.exp %213 : vector<2x1xf32>
    %cst_119 = arith.constant 1.000000e+00 : f32
    %215 = vector.broadcast %cst_119 : f32 to vector<2x1xf32>
    %216 = arith.addf %215, %214 : vector<2x1xf32>
    %cst_120 = arith.constant 1.000000e+00 : f32
    %217 = vector.broadcast %cst_120 : f32 to vector<2x1xf32>
    %218 = arith.divf %217, %216 : vector<2x1xf32>
    %c0_121 = arith.constant 0 : index
    %c0_122 = arith.constant 0 : index
    %c0_123 = arith.constant 0 : index
    %219 = vector.load %arg27[%c0_121, %c0_122, %c0_123] : memref<1x2x16xf32, #tpu.memory_space<vmem>>, vector<1x2x16xf32>
    %220 = vector.shape_cast %219 : vector<1x2x16xf32> to vector<2x16xf32>
    %221 = vector.shape_cast %203 : vector<2x16xf32> to vector<1x2x16xf32>
    tpu.vector_store %arg27[%c0_121, %c0_122, %c0_123], %221 {strides = array<i32>} : memref<1x2x16xf32, #tpu.memory_space<vmem>>, vector<1x2x16xf32>,
    %c0_124 = arith.constant 0 : index
    %c0_125 = arith.constant 0 : index
    %c0_126 = arith.constant 0 : index
    %222 = vector.load %arg28[%c0_124, %c0_125, %c0_126] : memref<1x2x16xf32, #tpu.memory_space<vmem>>, vector<1x2x16xf32>
    %223 = vector.shape_cast %222 : vector<1x2x16xf32> to vector<2x16xf32>
    %224 = vector.shape_cast %141 : vector<2x16xf32> to vector<1x2x16xf32>
    tpu.vector_store %arg28[%c0_124, %c0_125, %c0_126], %224 {strides = array<i32>} : memref<1x2x16xf32, #tpu.memory_space<vmem>>, vector<1x2x16xf32>,
    %c0_127 = arith.constant 0 : index
    %c0_128 = arith.constant 0 : index
    %c0_129 = arith.constant 0 : index
    %225 = vector.load %arg29[%c0_127, %c0_128, %c0_129] : memref<1x2x1xf32, #tpu.memory_space<vmem>>, vector<1x2x1xf32>
    %226 = vector.shape_cast %225 : vector<1x2x1xf32> to vector<2x1xf32>
    %227 = vector.shape_cast %218 : vector<2x1xf32> to vector<1x2x1xf32>
    tpu.vector_store %arg29[%c0_127, %c0_128, %c0_129], %227 {strides = array<i32>} : memref<1x2x1xf32, #tpu.memory_space<vmem>>, vector<1x2x1xf32>,
    return
  }
  func.func @transform_0(%arg0: i32) -> (i32, i32, i32) {
    %c0_i32 = arith.constant 0 : i32
    %c0_i32_0 = arith.constant 0 : i32
    %c0_i32_1 = arith.constant 0 : i32
    return %arg0, %c0_i32, %c0_i32_0 : i32, i32, i32
  }
  func.func @transform_1(%arg0: i32) -> (i32, i32, i32) {
    %c0_i32 = arith.constant 0 : i32
    %c0_i32_0 = arith.constant 0 : i32
    %c0_i32_1 = arith.constant 0 : i32
    %c0_i32_2 = arith.constant 0 : i32
    return %c0_i32, %c0_i32_0, %c0_i32_1 : i32, i32, i32
  }
  func.func @transform_2(%arg0: i32) -> (i32, i32) {
    %c0_i32 = arith.constant 0 : i32
    %c0_i32_0 = arith.constant 0 : i32
    %c0_i32_1 = arith.constant 0 : i32
    return %c0_i32, %c0_i32_0 : i32, i32
  }
  func.func @transform_3(%arg0: i32) -> (i32, i32) {
    %c0_i32 = arith.constant 0 : i32
    %c0_i32_0 = arith.constant 0 : i32
    %c0_i32_1 = arith.constant 0 : i32
    return %c0_i32, %c0_i32_0 : i32, i32
  }
  func.func @transform_4(%arg0: i32) -> (i32, i32) {
    %c0_i32 = arith.constant 0 : i32
    %c0_i32_0 = arith.constant 0 : i32
    %c0_i32_1 = arith.constant 0 : i32
    return %c0_i32, %c0_i32_0 : i32, i32
  }
  func.func @transform_5(%arg0: i32) -> (i32, i32) {
    %c0_i32 = arith.constant 0 : i32
    %c0_i32_0 = arith.constant 0 : i32
    %c0_i32_1 = arith.constant 0 : i32
    return %c0_i32, %c0_i32_0 : i32, i32
  }
  func.func @transform_6(%arg0: i32) -> (i32, i32) {
    %c0_i32 = arith.constant 0 : i32
    %c0_i32_0 = arith.constant 0 : i32
    %c0_i32_1 = arith.constant 0 : i32
    return %c0_i32, %c0_i32_0 : i32, i32
  }
  func.func @transform_7(%arg0: i32) -> (i32, i32) {
    %c0_i32 = arith.constant 0 : i32
    %c0_i32_0 = arith.constant 0 : i32
    %c0_i32_1 = arith.constant 0 : i32
    return %c0_i32, %c0_i32_0 : i32, i32
  }
  func.func @transform_8(%arg0: i32) -> (i32, i32) {
    %c0_i32 = arith.constant 0 : i32
    %c0_i32_0 = arith.constant 0 : i32
    %c0_i32_1 = arith.constant 0 : i32
    return %c0_i32, %c0_i32_0 : i32, i32
  }
  func.func @transform_9(%arg0: i32) -> (i32, i32) {
    %c0_i32 = arith.constant 0 : i32
    %c0_i32_0 = arith.constant 0 : i32
    %c0_i32_1 = arith.constant 0 : i32
    return %c0_i32, %c0_i32_0 : i32, i32
  }
  func.func @transform_10(%arg0: i32) -> (i32, i32) {
    %c0_i32 = arith.constant 0 : i32
    %c0_i32_0 = arith.constant 0 : i32
    %c0_i32_1 = arith.constant 0 : i32
    return %c0_i32, %c0_i32_0 : i32, i32
  }
  func.func @transform_11(%arg0: i32) -> (i32, i32) {
    %c0_i32 = arith.constant 0 : i32
    %c0_i32_0 = arith.constant 0 : i32
    %c0_i32_1 = arith.constant 0 : i32
    return %c0_i32, %c0_i32_0 : i32, i32
  }
  func.func @transform_12(%arg0: i32) -> (i32, i32) {
    %c0_i32 = arith.constant 0 : i32
    %c0_i32_0 = arith.constant 0 : i32
    %c0_i32_1 = arith.constant 0 : i32
    return %c0_i32, %c0_i32_0 : i32, i32
  }
  func.func @transform_13(%arg0: i32) -> (i32, i32) {
    %c0_i32 = arith.constant 0 : i32
    %c0_i32_0 = arith.constant 0 : i32
    %c0_i32_1 = arith.constant 0 : i32
    return %c0_i32, %c0_i32_0 : i32, i32
  }
  func.func @transform_14(%arg0: i32) -> (i32, i32) {
    %c0_i32 = arith.constant 0 : i32
    %c0_i32_0 = arith.constant 0 : i32
    %c0_i32_1 = arith.constant 0 : i32
    return %c0_i32, %c0_i32_0 : i32, i32
  }
  func.func @transform_15(%arg0: i32) -> (i32, i32) {
    %c0_i32 = arith.constant 0 : i32
    %c0_i32_0 = arith.constant 0 : i32
    %c0_i32_1 = arith.constant 0 : i32
    return %c0_i32, %c0_i32_0 : i32, i32
  }
  func.func @transform_16(%arg0: i32) -> (i32, i32) {
    %c0_i32 = arith.constant 0 : i32
    %c0_i32_0 = arith.constant 0 : i32
    %c0_i32_1 = arith.constant 0 : i32
    return %c0_i32, %c0_i32_0 : i32, i32
  }
  func.func @transform_17(%arg0: i32) -> (i32, i32) {
    %c0_i32 = arith.constant 0 : i32
    %c0_i32_0 = arith.constant 0 : i32
    %c0_i32_1 = arith.constant 0 : i32
    return %c0_i32, %c0_i32_0 : i32, i32
  }
  func.func @transform_18(%arg0: i32) -> (i32, i32) {
    %c0_i32 = arith.constant 0 : i32
    %c0_i32_0 = arith.constant 0 : i32
    %c0_i32_1 = arith.constant 0 : i32
    return %c0_i32, %c0_i32_0 : i32, i32
  }
  func.func @transform_19(%arg0: i32) -> (i32, i32) {
    %c0_i32 = arith.constant 0 : i32
    %c0_i32_0 = arith.constant 0 : i32
    %c0_i32_1 = arith.constant 0 : i32
    return %c0_i32, %c0_i32_0 : i32, i32
  }
  func.func @transform_20(%arg0: i32) -> (i32, i32) {
    %c0_i32 = arith.constant 0 : i32
    %c0_i32_0 = arith.constant 0 : i32
    %c0_i32_1 = arith.constant 0 : i32
    return %c0_i32, %c0_i32_0 : i32, i32
  }
  func.func @transform_21(%arg0: i32) -> (i32, i32) {
    %c0_i32 = arith.constant 0 : i32
    %c0_i32_0 = arith.constant 0 : i32
    %c0_i32_1 = arith.constant 0 : i32
    return %c0_i32, %c0_i32_0 : i32, i32
  }
  func.func @transform_22(%arg0: i32) -> (i32, i32) {
    %c0_i32 = arith.constant 0 : i32
    %c0_i32_0 = arith.constant 0 : i32
    %c0_i32_1 = arith.constant 0 : i32
    return %c0_i32, %c0_i32_0 : i32, i32
  }
  func.func @transform_23(%arg0: i32) -> (i32, i32) {
    %c0_i32 = arith.constant 0 : i32
    %c0_i32_0 = arith.constant 0 : i32
    %c0_i32_1 = arith.constant 0 : i32
    return %c0_i32, %c0_i32_0 : i32, i32
  }
  func.func @transform_24(%arg0: i32) -> (i32, i32) {
    %c0_i32 = arith.constant 0 : i32
    %c0_i32_0 = arith.constant 0 : i32
    %c0_i32_1 = arith.constant 0 : i32
    return %c0_i32, %c0_i32_0 : i32, i32
  }
  func.func @transform_25(%arg0: i32) -> (i32, i32) {
    %c0_i32 = arith.constant 0 : i32
    %c0_i32_0 = arith.constant 0 : i32
    %c0_i32_1 = arith.constant 0 : i32
    return %c0_i32, %c0_i32_0 : i32, i32
  }
  func.func @transform_26(%arg0: i32) -> (i32, i32, i32) {
    %c0_i32 = arith.constant 0 : i32
    %c0_i32_0 = arith.constant 0 : i32
    %c0_i32_1 = arith.constant 0 : i32
    return %arg0, %c0_i32, %c0_i32_0 : i32, i32, i32
  }
  func.func @transform_27(%arg0: i32) -> (i32, i32, i32) {
    %c0_i32 = arith.constant 0 : i32
    %c0_i32_0 = arith.constant 0 : i32
    %c0_i32_1 = arith.constant 0 : i32
    return %arg0, %c0_i32, %c0_i32_0 : i32, i32, i32
  }
  func.func @transform_28(%arg0: i32) -> (i32, i32, i32) {
    %c0_i32 = arith.constant 0 : i32
    %c0_i32_0 = arith.constant 0 : i32
    %c0_i32_1 = arith.constant 0 : i32
    return %arg0, %c0_i32, %c0_i32_0 : i32, i32, i32
  }
}

</mosaic_0001>

<bundles_post_ra>
// kernel: tpu_custom_call.1
= control target key start
LH: loop header
LB: loop body
LE: loop exit
PB: predicated region body
PF: predicated region fallthrough
CT: control target
= control target key end

     0   :  { %s4029_s0 = inlined_call_operand.vmem [shape: f32[4,2,8], index: 0, kind: input, shape index: {}]   ;;  %s4030_s1 = inlined_call_operand.vmem [shape: f32[2,16,32], index: 1, kind: input, shape index: {}]   ;;  %s4031_s2 = inlined_call_operand.vmem [shape: f32[2,16], index: 2, kind: input, shape index: {}]   ;;  %s4032_s3 = inlined_call_operand.vmem [shape: f32[8,32], index: 3, kind: input, shape index: {}]   ;;  %s4033_s4 = inlined_call_operand.vmem [shape: f32[1,32], index: 4, kind: input, shape index: {}]   ;;  %s4034_s5 = inlined_call_operand.vmem [shape: f32[32,16], index: 5, kind: input, shape index: {}]   ;;  %s4035_s6 = inlined_call_operand.vmem [shape: f32[1,16], index: 6, kind: input, shape index: {}]   ;;  %s4036_s7 = inlined_call_operand.vmem [shape: f32[16,128], index: 7, kind: input, shape index: {}]   ;;  %s4037_s8 = inlined_call_operand.vmem [shape: f32[32,128], index: 8, kind: input, shape index: {}]   ;;  %s4038_s9 = inlined_call_operand.vmem [shape: f32[32,128], index: 9, kind: input, shape index: {}]   ;;  %s4039_s10 = inlined_call_operand.vmem [shape: f32[1,128], index: 10, kind: input, shape index: {}]   ;;  %s4040_s11 = inlined_call_operand.vmem [shape: f32[32,16], index: 11, kind: input, shape index: {}]   ;;  %s4041_s12 = inlined_call_operand.vmem [shape: f32[32,16], index: 12, kind: input, shape index: {}]   ;;  %s4042_s13 = inlined_call_operand.vmem [shape: f32[5,4], index: 13, kind: input, shape index: {}]   ;;  %s4043_s14 = inlined_call_operand.vmem [shape: f32[4,16], index: 14, kind: input, shape index: {}]   ;;  %s4044_s15 = inlined_call_operand.vmem [shape: f32[1,16], index: 15, kind: input, shape index: {}]   ;;  %s4045_s16 = inlined_call_operand.vmem [shape: f32[32,128], index: 16, kind: input, shape index: {}]   ;;  %s4046_s17 = inlined_call_operand.vmem [shape: f32[32,128], index: 17, kind: input, shape index: {}]   ;;  %s4047_s18 = inlined_call_operand.vmem [shape: f32[32,128], index: 18, kind: input, shape index: {}]   ;;  %s4048_s19 = inlined_call_operand.vmem [shape: f32[1,128], index: 19, kind: input, shape index: {}]   ;;  %s4049_s20 = inlined_call_operand.vmem [shape: f32[32,16], index: 20, kind: input, shape index: {}]   ;;  %s4050_s21 = inlined_call_operand.vmem [shape: f32[32,16], index: 21, kind: input, shape index: {}]   ;;  %s4051_s22 = inlined_call_operand.vmem [shape: f32[1,16], index: 22, kind: input, shape index: {}]   ;;  %s4052_s23 = inlined_call_operand.vmem [shape: f32[32,1], index: 23, kind: input, shape index: {}]   ;;  %s4053_s24 = inlined_call_operand.vmem [shape: f32[32,1], index: 24, kind: input, shape index: {}]   ;;  %s4054_s25 = inlined_call_operand.<no memory space> [shape: f32[1,1], index: 25, kind: input, shape index: {}]   ;;  %s4055_s26 = inlined_call_operand.hbm [shape: f32[4,2,16], index: 26, kind: output, shape index: {0}]   ;;  %s4056_s27 = inlined_call_operand.hbm [shape: f32[4,2,16], index: 27, kind: output, shape index: {1}]   ;;  %s4057_s28 = inlined_call_operand.vmem [shape: f32[4,2,1], index: 28, kind: output, shape index: {2}]  }
   0x1   :  { %4083 = sst [smem:[#allocation24_spill]] %s4029_s0  ;;  %v34_v0 = vstv %s4054_s25 }
   0x2   :  { %4084 = sst [smem:[#allocation25_spill]] %s4030_s1  ;;  %35 = vst [vmem:[#allocation9] sm:$0x1] %v34_v0 }
   0x3   :  { %4085 = sst [smem:[#allocation26_spill]] %s4031_s2 }
   0x4   :  { %4086 = sst [smem:[#allocation27_spill]] %s4032_s3 }
   0x5   :  { %4087 = sst [smem:[#allocation28_spill]] %s4033_s4 }
   0x6   :  { %4088 = sst [smem:[#allocation29_spill]] %s4034_s5 }
   0x7   :  { %4089 = sst [smem:[#allocation30_spill]] %s4035_s6 }
   0x8   :  { %4090 = sst [smem:[#allocation31_spill]] %s4036_s7 }
   0x9   :  { %4091 = sst [smem:[#allocation32_spill]] %s4037_s8 }
   0xa   :  { %4092 = sst [smem:[#allocation33_spill]] %s4038_s9 }
   0xb   :  { %4093 = sst [smem:[#allocation34_spill]] %s4039_s10 }
   0xc   :  { %4094 = sst [smem:[#allocation35_spill]] %s4040_s11 }
   0xd   :  { %4095 = sst [smem:[#allocation36_spill]] %s4041_s12 }
   0xe   :  { %4096 = sst [smem:[#allocation37_spill]] %s4055_s26 }
   0xf   :  { %4097 = sst [smem:[#allocation38_spill]] %s4057_s28 }
  0x10   :  { %36 = vsyncpa [#allocation11], 0 }
  0x11   :  { %38 = vsyncpa [#allocation11 + $0x1], 0 }
  0x12   :  { %39 = vsyncpa [#allocation13], 0 }
  0x13   :  { %41 = vsyncpa [#allocation13 + $0x1], 0  ;;  %s3500_s9 = smov 0   ;;  %s3502_s30 = smov 0  }
  0x14   :  { %s3504_s3 = smov 0   ;;  %s3506_s6 = smov 0  }
  0x15 LB: > { %4098 = sst [smem:[#allocation16_spill]] %s3326_s9  ;;  %s3521_s25 = sadd.s32 4294967295, %s3338_s6   ;;  %s3338_s6 = sphi %s3506_s6, %s4132_s6   ;;  %s3334_s3 = sphi %s3504_s3, %s4135_s3   ;;  %s3330_s30 = sphi %s3502_s30, %s4134_s30   ;;  %s3326_s9 = sphi %s3500_s9, %s4133_s9  }
  0x16   : > { %4099 = sst [smem:[#allocation17_spill]] %s3330_s30  ;;  %s2804_s10 = sadd.s32 4294967294, %s3338_s6  }
  0x17   : > { %4100 = sst [smem:[#allocation18_spill]] %s3334_s3  ;;  %s3525_s0 = sadd.s32 1, %s3338_s6  }
  0x18   : > { %4101 = sst [smem:[#allocation19_spill]] %s3338_s6  ;;  %s605_s11 = sadd.s32 1, %s3334_s3 }
  0x19   : > { %4102 = sst [smem:[#allocation20_spill]] %s3525_s0  ;;  %s602_s29 = ssub.s32 %s3338_s6, %s3525_s0 }
  0x1a   : > { %p615_p0 = scmp.ne.s32.totalorder %s3334_s3, %s3330_s30  ;;  %p603_p1 = scmp.eq.s32.totalorder %s602_s29, 0 }
  0x1b   : > { %p616_p2 = scmp.eq.s32.totalorder %s3521_s25, 3  ;;  %p621_p3 = scmp.ne.s32.totalorder %s3330_s30, %s3326_s9 }
  0x1c   : > { %p622_p4 = scmp.eq.s32.totalorder %s2804_s10, 3  ;;  %p2807_p7 = scmp.ge.s32.totalorder %s3338_s6, 1 }
  0x1d   : > { %s3536_s2 = scalar_select %p603_p1, %s3334_s3, %s605_s11  }
  0x1e   : > { %p3538_p5 = por %p616_p2, %p615_p0  ;;  %p3542_p6 = por %p622_p4, %p621_p3 }
  0x1f   : > { %4103 = sst [smem:[#allocation21_spill]] %s3536_s2  ;;  %p774_p8 = scmp.lt.s32.totalorder %s3338_s6, 5 }
  0x20   : > { %s4105_s12 = scalar_select %p3542_p6, 1, 0 }
  0x21   : > { %p775_p9 = pnand %p2807_p7, %p774_p8 }
  0x22   : > { %4106 = sst [smem:[#allocation22_spill]] %s4105_s12 }
  0x23   : > { %778 = sbr.rel (%p775_p9) target bundleno = 3550 (0xdde), region = 124 }
  0x2a   : > { %s3549_s1 = sand.u32 1, %s3330_s30   ;;  %p856_p10 = scmp.lt.s32.totalorder %s3521_s25, 3 }
  0x2b   : > { %s2808_s4 = sshll.u32 %s3549_s1, 1  ;;  %s4107_s29 = sld [smem:[#allocation24_spill]] }
  0x2c   : > { %s857_s8 = scalar_select %p856_p10, %s3521_s25, 3 }
  0x2d   : > { %s4108_s28 = sld [smem:[#allocation38_spill]]  ;;  %s3564_s9 = scalar_lea.vmem [#allocation10], %s2808_s4 }
  0x2e   : > { %s2810_s5 = sshll.u32 %s857_s8, 1  ;;  %s3566_s6 = scalar_lea.vmem [#allocation12], %s2808_s4 }
  0x2f   : > { %p2812_p11 = scmp.ne.s32.totalorder %s3521_s25, 0 }
  0x30   : > { %vm868_vm0 = vcmask (!%p2812_p11), 254976   ;;  %vm874_vm1 = vcmask (!%p2812_p11), 123904   ;;  %s4110_s26 = sld [smem:[#allocation35_spill]] (!%p2812_p11)  ;;  %v3340_v4 = vmov (!%p2812_p11), 0.0   ;;  %s4111_s8 = sld [smem:[#allocation25_spill]] (!%p2812_p11)  ;;  %vm884_vm2 = vcmask (!%p2812_p11), 261120  }
  0x31   : > { %s3557_s2 = scalar_lea.vmem %s4107_s29, %s2810_s5  ;;  %867 = sbr.rel (%p2812_p11) target bundleno = 279 (0x117), region = 128  ;;  %869 = vst.msk [vmem:[#allocation3] sm:$0x3] (!%p2812_p11), %vm868_vm0, %v3340_v4  ;;  %870 = vst.msk [vmem:[#allocation4] sm:$0x3] (!%p2812_p11), %vm868_vm0, %v3340_v4  ;;  %vm982_vm3 = vcmask (!%p2812_p11), 130048  }
  0x32   : > { %871 = vst.msk [vmem:[#allocation5] sm:$0x3] (!%p2812_p11), %vm868_vm0, %v3340_v4  ;;  %872 = vst.msk [vmem:[#allocation6] sm:$0x3] (!%p2812_p11), %vm868_vm0, %v3340_v4 }
  0x33   : > { %s3562_s12 = scalar_lea.vmem %s4108_s28, %s2810_s5  ;;  %873 = vst.msk [vmem:[#allocation7] sm:$0x3] (!%p2812_p11), %vm868_vm0, %v3340_v4 }
  0x34   : > { %4109 = sst [smem:[#allocation23_spill]] %s3562_s12  ;;  %875 = vst.msk [vmem:[#allocation8] sm:$0x3] (!%p2812_p11), %vm874_vm1, %v3340_v4 }
  0x36   : > { %v880_v1 = vld [vmem:[%s4110_s26] sm:$0xff] (!%p2812_p11)  ;;  %v881_v2 = vld [vmem:[%s4110_s26 + $0x8] sm:$0xff] (!%p2812_p11)  ;;  %v882_v3 = vld [vmem:[%s4110_s26 + $0x10] sm:$0xff] (!%p2812_p11) }
  0x37   : > { %v3067_v5 = vpack.c.bf16 (!%p2812_p11), %v881_v2, %v880_v1  ;;  %v883_v6 = vld [vmem:[%s4110_s26 + $0x18] sm:$0xff] (!%p2812_p11)  ;;  %v876_v7 = vld [vmem:[%s4111_s8] sm:$0xff] (!%p2812_p11)  ;;  %v878_v8 = vld [vmem:[%s4111_s8 + $0x10] sm:$0xff] (!%p2812_p11) }
  0x38   : > { %v3071_v9 = vpack.c.bf16 %v883_v6, %v882_v3  ;;  %2923 = vmatprep.mubr.msk.f32.mxu0 %vm884_vm2, %v876_v7  ;;  %2926 = vmatprep.mubr.msk.f32.mxu1 %vm884_vm2, %v878_v8  ;;  %v877_v10 = vld [vmem:[%s4111_s8 + $0x8] sm:$0xff]  ;;  %v879_v11 = vld [vmem:[%s4111_s8 + $0x18] sm:$0xff] }
  0x39   : > { %3068 = vmatprep.subr.bf16.mxu0 %v3067_v5  ;;  %3144 = vmatprep.subr.bf16.mxu1 %v3067_v5 }
  0x3a   : > { %3070 = vmatpush3.bf16.msra.mxu0 %v3067_v5  ;;  %3146 = vmatpush3.bf16.msra.mxu1 %v3067_v5 }
  0x3b   : > { %3072 = vmatprep.subr.bf16.mxu0 %v3071_v9  ;;  %3145 = vmatprep.subr.bf16.mxu1 %v3071_v9 }
  0x3e   : > { %3074 = vmatpush3.bf16.msra.mxu0 %v3071_v9  ;;  %3147 = vmatpush3.bf16.msra.mxu1 %v3071_v9 }
  0x41   : > { %2924 = vmatmul.mubr.msk.f32.vlgmr.msra.gmra.mrb[0].mxu0 %vm884_vm2, %v877_v10  ;;  %2927 = vmatmul.mubr.msk.f32.vlgmr.msra.gmra.mrb[0].mxu1 %vm884_vm2, %v879_v11 }
 0x114   : > { %v2925_v12 = vpop.f32.mrb[0].mxu0  ;;  %v2928_v13 = vpop.f32.mrb[0].mxu1 }
 0x115   : > { %984 = vst.msk [vmem:[#allocation2 + $0x8] sm:$0xff] %vm982_vm3, %v2925_v12  ;;  %986 = vst.msk [vmem:[#allocation2 + $0x18] sm:$0xff] %vm982_vm3, %v2928_v13  ;;  %v963_v14 = vpop.f32.mrb[1].mxu0  ;;  %v973_v15 = vpop.f32.mrb[1].mxu1 }
 0x116   : > { %983 = vst.msk [vmem:[#allocation2] sm:$0xff] %vm982_vm3, %v963_v14  ;;  %985 = vst.msk [vmem:[#allocation2 + $0x10] sm:$0xff] %vm982_vm3, %v973_v15 }
 0x117 PF: > { %s4112_s10 = sld [smem:[#allocation27_spill]]  ;;  %v987_v17 = vld [vmem:[%s3557_s2] sm:$0x3]  ;;  %vm996_vm4 = vcmask 64512   ;;  %v3341_v18 = vmov 0.0   ;;  %vm3342_vm5 = vmmov 0  }
 0x118   : > { %2929 = vmatprep.subr.mxu0 %v3341_v18  ;;  %2931 = vmatprep.mubr.msk.f32.mxu0 %vm3342_vm5, %v3341_v18  ;;  %s4113_s3 = sld [smem:[#allocation29_spill]]  ;;  %v3343_v21 = vmov 0.0|0.0   ;;  %s4117_s26 = sld [smem:[#allocation28_spill]]  ;;  %vm1082_vm6 = vcmask 261120   ;;  %vm1237_vm7 = vcmask 130048   ;;  %vm1529_vm8 = vcmask 1043456  }
 0x119   : > { %3075 = vmatprep.subr.bf16.mxu1 %v3343_v21  ;;  %2942 = vmatprep.mubr.msk.f32.mxu1 %vm3342_vm5, %v3341_v18  ;;  %s4118_s8 = sld [smem:[#allocation31_spill]]  ;;  %v1157_v39 = vld [vmem:[#allocation7] sm:$0x3]  ;;  %s4119_s30 = sld [smem:[#allocation30_spill]]  ;;  %v1311_v52 = vld [vmem:[#allocation3] sm:$0x3] }
 0x11a   : > { %s4077_s28 = smov 64   ;;  %v1405_v0 = vld [vmem:[#allocation4] sm:$0x3]  ;;  %s4075_s12 = smov 32   ;;  %vm1525_vm9 = vcmask 31744   ;;  %vm1519_vm10 = vcmask 15360  }
 0x11b   : > { %v1524_v12 = vld [vmem:[%s4043_s14] sm:$0xf]  ;;  %vm1521_vm11 = vcmask 146432   ;;  %s4125_s2 = sld [smem:[#allocation26_spill]]  ;;  %vm1431_vm12 = vcmask 254976   ;;  %vm1880_vm13 = vcmask 130112  }
 0x11c   : > { %v1523_v13 = vld [vmem:[%s4042_s13] sm:$0x1f]  ;;  %vm1891_vm14 = vcmask 1041409   ;;  %vm1894_vm15 = vcmask 123904   ;;  %s3349_s29 = smov 96   ;;  %s2686_s11 = sshll.u32 %s3566_s6, 4  ;;  %s2687_s11 = int_to_ptr.vmem [resolvable:$true] %s2686_s11 }
 0x11d   : > { %v988_v16 = vld [vmem:[%s4112_s10] sm:$0xff]  ;;  %s4121_s10 = sld [smem:[#allocation34_spill]] }
 0x11e   : > { %s4114_s0 = smov %s4113_s3  ;;  %v1071_v19 = vld [vmem:[%s4113_s3] sm:$0xff]  ;;  %2930 = vmatpush3.msra.mxu0 %v988_v16  ;;  %s4115_s3 = sld [smem:[#allocation32_spill]] }
 0x11f   : > { %v1072_v20 = vld [vmem:[%s4114_s0 + $0x8] sm:$0xff]  ;;  %2932 = vmatmul.mubr.msk.f32.vlgmr.msra.gmra.mrb[0].mxu0 %vm996_vm4, %v987_v17  ;;  %3081 = vmatprep.subr.bf16.mxu0 %v3343_v21  ;;  %v1073_v23 = vld [vmem:[%s4114_s0 + $0x10] sm:$0xff]  ;;  %v1074_v24 = vld [vmem:[%s4114_s0 + $0x18] sm:$0xff]  ;;  %s4123_s0 = smov 64  }
 0x120   : > { %v3076_v22 = vpack.c.bf16 %v1072_v20, %v1071_v19  ;;  %2953 = vmatprep.mubr.msk.f32.mxu0 %vm3342_vm5, %v3341_v18  ;;  %v3079_v25 = vpack.c.bf16 %v1074_v24, %v1073_v23  ;;  %v2817_v32 = vld [vmem:[%s4117_s26] ss:$0 sm:$0xff]  ;;  %v1159_v38 = vld [vmem:[%s4118_s8 + $0x8] sm:$0xff]  ;;  %s4120_s26 = sld [smem:[#allocation33_spill]]  ;;  %v2052_v24 = vld [vmem:[%s4045_s16 + $0x10] sm:$0xff] }
 0x121   : > { %v1158_v37 = vld [vmem:[%s4118_s8] sm:$0xff]  ;;  %v2051_v19 = vld [vmem:[%s4045_s16 + $0x8] sm:$0xff]  ;;  %s4124_s8 = smov 32  }
 0x122   : > { %3077 = vmatpush3.bf16.msra.mxu1 %v3076_v22  ;;  %v3088_v40 = vpack.c.bf16 %v1159_v38, %v1158_v37  ;;  %v2819_v41 = vld [vmem:[%s4119_s30] ss:$0 sm:$0xff]  ;;  %s4126_s30 = sld [smem:[#allocation25_spill]] }
 0x123   : > { %3078 = vmatprep.subr.bf16.mxu1 %v3343_v21  ;;  %v2824_v59 = vld [vmem:[%s4121_s10] ss:$0 sm:$0xff]  ;;  %s4122_s10 = sld [smem:[#allocation36_spill]] }
 0x124   : > { %s4116_s4 = smov %s4115_s3  ;;  %v1160_v26 = vld [vmem:[%s4115_s3] sm:$0xff]  ;;  %s3244_s3 = scalar_lea.vmem %s2687_s11, 32 }
 0x125   : > { %v1161_v27 = vld [vmem:[%s4116_s4 + $0x8] sm:$0xff]  ;;  %v1162_v28 = vld [vmem:[%s4116_s4 + $0x10] sm:$0xff]  ;;  %v1163_v30 = vld [vmem:[%s4116_s4 + $0x18] sm:$0xff]  ;;  %s3346_s4 = smov 2   ;;  %p3245_p12 = scmp.ne.s32.totalorder %s2687_s11, %s3244_s3 }
 0x126   : > { %3080 = vmatpush3.bf16.msra.mxu1 %v3079_v25  ;;  %v3082_v29 = vpack.c.bf16 %v1161_v27, %v1160_v26  ;;  %v3085_v31 = vpack.c.bf16 %v1163_v30, %v1162_v28  ;;  %v1312_v42 = vld [vmem:[%s4120_s26] sm:$0xff]  ;;  %v1313_v43 = vld [vmem:[%s4120_s26 + $0x8] sm:$0xff]  ;;  %v1314_v49 = vld [vmem:[%s4120_s26 + $0x10] sm:$0xff]  ;;  %v1603_v30 = vlaneseq }
 0x127   : > { %3096 = vmatprep.subr.bf16.mxu1 %v3343_v21  ;;  %v3091_v47 = vpack.c.bf16 %v1313_v43, %v1312_v42  ;;  %v1315_v50 = vld [vmem:[%s4120_s26 + $0x18] sm:$0xff]  ;;  %v2050_v17 = vld [vmem:[%s4045_s16] sm:$0xff]  ;;  %p3246_p13 = pnand %p3245_p12, %p3538_p5 }
 0x128   : > { %3083 = vmatpush3.bf16.msra.mxu0 %v3082_v29  ;;  %v3094_v51 = vpack.c.bf16 %v1315_v50, %v1314_v49  ;;  %v3109_v22 = vpack.c.bf16 %v2051_v19, %v2050_v17  ;;  %v2053_v25 = vld [vmem:[%s4045_s16 + $0x18] sm:$0xff]  ;;  %v3724_v29 = vld [vmem:[#allocation8] sm:$0x3] }
 0x129   : > { %3084 = vmatprep.subr.bf16.mxu0 %v3343_v21  ;;  %v1438_v14 = vld [vmem:[%s4122_s10] sm:$0xff]  ;;  %v1439_v15 = vld [vmem:[%s4122_s10 + $0x8] sm:$0xff]  ;;  %v1440_v20 = vld [vmem:[%s4122_s10 + $0x10] sm:$0xff]  ;;  %v3112_v27 = vpack.c.bf16 %v2053_v25, %v2052_v24  ;;  %p3247_p0 = pneg %p3246_p13 }
 0x12a   : > { %v3097_v16 = vpack.c.bf16 %v1439_v15, %v1438_v14  ;;  %v1441_v23 = vld [vmem:[%s4122_s10 + $0x18] sm:$0xff] }
 0x12b   : > { %v3100_v26 = vpack.c.bf16 %v1441_v23, %v1440_v20 }
 0x12c   : > { %3086 = vmatpush3.bf16.msra.mxu0 %v3085_v31  ;;  %v3728_v31 = vshrl.u32 %v1603_v30, 7 }
 0x12d   : > { %3087 = vmatprep.subr.bf16.mxu0 %v3343_v21 }
 0x12e   : > { %v1739_v19 = vsub.s32 4, %v3728_v31 }
 0x12f   : > { %2954 = vmatmul.mubr.msk.f32.vlgmr.msra.gmra.mrb[2].mxu0 %vm1082_vm6, %v1157_v39 }
 0x130   : > { %3089 = vmatpush3.bf16.msra.mxu0 %v3088_v40  ;;  %2960 = vmatprep.mubr.msk.f32.mxu0 %vm3342_vm5, %v3341_v18 }
 0x131   : > { %3090 = vmatprep.subr.bf16.mxu0 %v3343_v21 }
 0x1f2   : > { %v1066_v33 = vpop.f32.mrb[0].mxu0 }
 0x1f3   : > { %v1067_v34 = vadd.f32 %v2817_v32, %v1066_v33  ;;  %v2933_v35 = vpop.f32.mrb[1].mxu0 }
 0x1f5   : > { %v1070_v36 = vmax.f32 %v1067_v34, 0.0  ;;  %v3732_v34 = vsub.s32 0, %v3728_v31 }
 0x1f7   : > { %2943 = vmatmul.mubr.msk.f32.vlgmr.msra.gmra.mrb[0].mxu1 %vm1082_vm6, %v1070_v36  ;;  %v3735_v36 = vsub.s32 1, %v3728_v31 }
 0x1f8   : > { %2982 = vmatprep.mubr.msk.f32.mxu1 %vm3342_vm5, %v3341_v18  ;;  %3098 = vmatpush3.bf16.msra.mxu1 %v3097_v16 }
 0x1f9   : > { %3099 = vmatprep.subr.bf16.mxu1 %v3343_v21 }
 0x1fc   : > { %3101 = vmatpush3.bf16.msra.mxu1 %v3100_v26 }
 0x1fd   : > { %3102 = vmatprep.subr.bf16.mxu1 %v3343_v21 }
 0x202   : > { %v1233_v53 = vpop.f32.mrb[2].mxu0 }
 0x203   : > { %v2955_v54 = vpop.f32.mrb[3].mxu0 }
 0x2ca   : > { %v1152_v44 = vpop.f32.mrb[0].mxu1 }
 0x2cb   : > { %v1153_v45 = vadd.f32 %v2819_v41, %v1152_v44  ;;  %v2944_v46 = vpop.f32.mrb[1].mxu1  ;;  %v3742_v41 = vld [vmem:[%s4125_s2] sm:$0x3] }
 0x2cc   : > { %v3746_v42 = vrot.slane %v3742_v41, %v3732_v34 }
 0x2cd   : > { %v1156_v48 = vmax.f32 %v1153_v45, 0.0 }
 0x2cf   : > { %2961 = vmatmul.mubr.msk.f32.vlgmr.msra.gmra.mrb[4].mxu0 %vm1237_vm7, %v1156_v48 }
 0x2d0   : > { %3092 = vmatpush3.bf16.msra.mxu0 %v3091_v47  ;;  %2971 = vmatprep.mubr.msk.f32.mxu0 %vm3342_vm5, %v3341_v18 }
 0x2d1   : > { %3093 = vmatprep.subr.bf16.mxu0 %v3343_v21 }
 0x2d4   : > { %3095 = vmatpush3.bf16.msra.mxu0 %v3094_v51 }
 0x2d5   : > { %2985 = vmatprep.subr.mxu0 %v3341_v18 }
 0x2d7   : > { %2972 = vmatmul.mubr.msk.f32.vlgmr.msra.gmra.mrb[6].mxu0 %vm1082_vm6, %v1311_v52 }
 0x2d8   : > { %2987 = vmatprep.mubr.msk.f32.mxu0 %vm3342_vm5, %v3341_v18  ;;  %2986 = vmatpush3.msk.msra.mxu0 %vm1529_vm8, %v1524_v12 }
 0x2d9   : > { %3108 = vmatprep.subr.bf16.mxu0 %v3343_v21 }
 0x2db   : > { %2988 = vmatmul.mubr.msk.f32.vlgmr.msra.gmra.mrb[8].mxu0 %vm1525_vm9, %v1523_v13 }
 0x2dc   : > { %3009 = vmatprep.mubr.msk.f32.mxu0 %vm3342_vm5, %v3341_v18  ;;  %3110 = vmatpush3.bf16.msra.mxu0 %v3109_v22 }
 0x2dd   : > { %3111 = vmatprep.subr.bf16.mxu0 %v3343_v21 }
 0x2e0   : > { %3113 = vmatpush3.bf16.msra.mxu0 %v3112_v27 }
 0x2e1   : > { %3120 = vmatprep.subr.bf16.mxu0 %v3343_v21 }
 0x3a2   : > { %v1307_v55 = vpop.f32.mrb[4].mxu0 }
 0x3a3   : > { %v1308_v56 = vadd.f32 %v1307_v55, %v1233_v53  ;;  %v2962_v57 = vpop.f32.mrb[5].mxu0 }
 0x3aa   : > { %v1385_v58 = vpop.f32.mrb[6].mxu0 }
 0x3ab   : > { %v1389_v60 = vadd.f32 %v1385_v58, %v1308_v56  ;;  %v2973_v61 = vpop.f32.mrb[7].mxu0 }
 0x3ad   : > { %v1397_v62 = vadd.f32 %v2824_v59, %v1389_v60 }
 0x3ae   : > { %v1599_v43 = vpop.f32.mrb[8].mxu0 }
 0x3af   : > { %3204 = vtanh.f32 %v1397_v62  ;;  %v1398_v1 = vsub.f32 0.0, %v1397_v62  ;;  %v2989_v44 = vpop.f32.mrb[9].mxu0  ;;  %v1628_v60 = vrot.slane %v1599_v43, %v3732_v34  ;;  %v1656_v61 = vrot.slane %v1599_v43, %v3735_v36 }
 0x3b0   : > { %v1683_v62 = vsub.s32 2, %v3728_v31 }
 0x3b1   : > { %v1399_v2 = vmul.f32 1.442695, %v1398_v1  ;;  %v3347_v1 = vmov 1966171168  }
 0x3b3   : > { %3206 = vpow2.f32 %v1399_v2  ;;  %v1751_v2 = vunpack.c.l.s4 %v3347_v1  ;;  %v1772_v1 = vld [vmem:[#allocation2] sm:$0xff] }
 0x3b5   : > { %v1752_v16 = vunpack.c.0.s8 %v1751_v2 }
 0x3b9   : > { %v3205_v63 = vpop.eup %3204 }
 0x3ba   : > { %1412 = vrot.lane.b32.xlu0 %v3205_v63, %s4077_s28 }
 0x3bd   : > { %v3207_v3 = vpop.eup %3206 }
 0x3be   : > { %1407 = vrot.lane.b32.xlu0 %v1405_v0, %s4075_s12  ;;  %v1401_v4 = vadd.f32 1.0, %v3207_v3  ;;  %v1684_v3 = vrot.slane %v1599_v43, %v1683_v62 }
 0x3c0   : > { %3208 = vrcp.f32 %v1401_v4  ;;  %v1711_v4 = vsub.s32 3, %v3728_v31 }
 0x3c2   : > { %v1712_v17 = vrot.slane %v1599_v43, %v1711_v4  ;;  %v1774_v4 = vld [vmem:[#allocation2 + $0x10] sm:$0xff] }
 0x3ca   : > { %v3209_v5 = vpop.eup %3208 }
 0x42c   : > { %v1413_v6 = vpop.permute.xlu0 %1412 }
 0x42d   : > { %v1415_v7 = vmul.f32 %v3209_v5, %v1413_v6 }
 0x42f   : > { %1417 = vrot.lane.b32.xlu1 %v1415_v7, %s4075_s12 }
 0x430   : > { %v1408_v8 = vpop.permute.xlu0 %1407 }
 0x431   : > { %v1410_v9 = vmul.f32 %v3209_v5, %v1408_v8 }
 0x4a1   : > { %v1418_v10 = vpop.permute.xlu1 %1417 }
 0x4a2   : > { %v3683_v11 = vadd.f32 %v1418_v10, %v1410_v9 }
 0x4a4   : > { %3210 = vtanh.f32 %v3683_v11 }
 0x4ae   : > { %v3211_v28 = vpop.eup %3210 }
 0x4af   : > { %1423 = vrot.lane.b32.xlu1 %v3211_v28, %s4123_s0 }
 0x4b3   : > { %1516 = vrot.lane.b32.xlu1 %v3724_v29, %s3346_s4  ;;  %s2656_s4 = scalar_lea.sflag [#allocation13], %s3549_s1 }
 0x521   : > { %v1424_v32 = vpop.permute.xlu1 %1423 }
 0x522   : > { %v1426_v33 = vmul.f32 %v3209_v5, %v1424_v32  ;;  %v1755_v32 = vsub.s32 %v1752_v16, %v3728_v31 }
 0x524   : > { %1428 = vrot.lane.b32.xlu0 %v1426_v33, %s4124_s8 }
 0x525   : > { %v1517_v35 = vpop.permute.xlu1 %1516 }
 0x526   : > { %v1520_v37 = vsel %vm1519_vm10, 0.0, %v1517_v35 }
 0x527   : > { %v1522_v38 = vsel %vm1521_vm11, %v1520_v37, 0.0  ;;  %v1740_v37 = vrot.slane %v1599_v43, %v1739_v19 }
 0x528   : > { %v1606_v39 = vrot.slane %v1522_v38, %v3732_v34  ;;  %v1617_v40 = vrot.slane %v1522_v38, %v3735_v36 }
 0x52a   : > { %1612 = vbcast.lane.b32.xlu1 %v1606_v39, 264  ;;  %1608 = vbcast.lane.b32.xlu0 %v1606_v39, 256 }
 0x52e   : > { %1623 = vbcast.lane.b32.xlu1 %v1617_v40, 264  ;;  %1619 = vbcast.lane.b32.xlu0 %v1617_v40, 256 }
 0x532   : > { %1643 = vbcast.lane.b32.xlu1 %v1606_v39, 265  ;;  %1639 = vbcast.lane.b32.xlu0 %v1606_v39, 257 }
 0x536   : > { %1651 = vbcast.lane.b32.xlu1 %v1617_v40, 265  ;;  %1647 = vbcast.lane.b32.xlu0 %v1617_v40, 257 }
 0x53a   : > { %1671 = vbcast.lane.b32.xlu1 %v1606_v39, 266  ;;  %1667 = vbcast.lane.b32.xlu0 %v1606_v39, 258 }
 0x53e   : > { %1679 = vbcast.lane.b32.xlu1 %v1617_v40, 266  ;;  %1675 = vbcast.lane.b32.xlu0 %v1617_v40, 258 }
 0x542   : > { %1699 = vbcast.lane.b32.xlu1 %v1606_v39, 267  ;;  %1695 = vbcast.lane.b32.xlu0 %v1606_v39, 259 }
 0x546   : > { %1707 = vbcast.lane.b32.xlu1 %v1617_v40, 267  ;;  %1703 = vbcast.lane.b32.xlu0 %v1617_v40, 259 }
 0x54a   : > { %1727 = vbcast.lane.b32.xlu1 %v1606_v39, 268  ;;  %1723 = vbcast.lane.b32.xlu0 %v1606_v39, 260 }
 0x54e   : > { %1735 = vbcast.lane.b32.xlu1 %v1617_v40, 268  ;;  %1731 = vbcast.lane.b32.xlu0 %v1617_v40, 260 }
 0x552   : > { %1828 = vbcast.lane.b32.xlu1 %v3746_v42, 256 }
 0x596   : > { %v1429_v45 = vpop.permute.xlu0 %1428 }
 0x597   : > { %1432 = vst.msk [vmem:[#allocation3] sm:$0x3] %vm1431_vm12, %v1429_v45  ;;  %2983 = vmatmul.mubr.msk.f32.vlgmr.msra.gmra.mrb[2].mxu1 %vm1082_vm6, %v1429_v45  ;;  %3010 = vmatmul.mubr.msk.f32.vlgmr.msra.gmra.mrb[10].mxu0 %vm1082_vm6, %v1429_v45 }
 0x598   : > { %2998 = vmatprep.mubr.msk.f32.mxu1 %vm3342_vm5, %v3341_v18  ;;  %3031 = vmatprep.mubr.msk.f32.mxu0 %vm3342_vm5, %v3341_v18 }
 0x59c   : > { %v1613_v46 = vpop.permute.xlu1 %1612  ;;  %v1609_v47 = vpop.permute.xlu0 %1608 }
 0x59d   : > { %v1630_v5 = vmul.f32 %v1628_v60, %v1613_v46  ;;  %v1629_v7 = vmul.f32 %v1628_v60, %v1609_v47 }
 0x5a0   : > { %v1624_v48 = vpop.permute.xlu1 %1623  ;;  %v1620_v49 = vpop.permute.xlu0 %1619 }
 0x5a1   : > { %v1632_v9 = vmul.f32 %v1628_v60, %v1624_v48  ;;  %v1631_v12 = vmul.f32 %v1628_v60, %v1620_v49 }
 0x5a4   : > { %v1644_v50 = vpop.permute.xlu1 %1643  ;;  %v1640_v51 = vpop.permute.xlu0 %1639 }
 0x5a5   : > { %v1658_v6 = vmul.f32 %v1656_v61, %v1644_v50  ;;  %v1657_v8 = vmul.f32 %v1656_v61, %v1640_v51 }
 0x5a7   : > { %v1662_v20 = vadd.f32 %v1658_v6, %v1630_v5  ;;  %v1661_v23 = vadd.f32 %v1657_v8, %v1629_v7  ;;  %v1775_v5 = vld [vmem:[#allocation2 + $0x18] sm:$0xff] }
 0x5a8   : > { %v1652_v52 = vpop.permute.xlu1 %1651  ;;  %v1648_v53 = vpop.permute.xlu0 %1647 }
 0x5a9   : > { %v1660_v10 = vmul.f32 %v1656_v61, %v1652_v52  ;;  %v1659_v13 = vmul.f32 %v1656_v61, %v1648_v53 }
 0x5ab   : > { %v1664_v25 = vadd.f32 %v1660_v10, %v1632_v9  ;;  %v1663_v27 = vadd.f32 %v1659_v13, %v1631_v12 }
 0x5ac   : > { %v1672_v54 = vpop.permute.xlu1 %1671  ;;  %v1668_v55 = vpop.permute.xlu0 %1667 }
 0x5ad   : > { %v1686_v22 = vmul.f32 %v1684_v3, %v1672_v54  ;;  %v1685_v24 = vmul.f32 %v1684_v3, %v1668_v55 }
 0x5af   : > { %v1690_v33 = vadd.f32 %v1686_v22, %v1662_v20  ;;  %v1689_v38 = vadd.f32 %v1685_v24, %v1661_v23  ;;  %v2828_v20 = vld [vmem:[%s4044_s15] ss:$0 sm:$0xff] }
 0x5b0   : > { %v1680_v56 = vpop.permute.xlu1 %1679  ;;  %v1676_v57 = vpop.permute.xlu0 %1675 }
 0x5b1   : > { %v1688_v26 = vmul.f32 %v1684_v3, %v1680_v56  ;;  %v1687_v28 = vmul.f32 %v1684_v3, %v1676_v57 }
 0x5b3   : > { %v1692_v45 = vadd.f32 %v1688_v26, %v1664_v25  ;;  %v1691_v47 = vadd.f32 %v1687_v28, %v1663_v27 }
 0x5b4   : > { %v1700_v58 = vpop.permute.xlu1 %1699  ;;  %v1696_v59 = vpop.permute.xlu0 %1695 }
 0x5b5   : > { %v1714_v35 = vmul.f32 %v1712_v17, %v1700_v58  ;;  %v1713_v39 = vmul.f32 %v1712_v17, %v1696_v59 }
 0x5b7   : > { %v1718_v54 = vadd.f32 %v1714_v35, %v1690_v33  ;;  %v1717_v56 = vadd.f32 %v1713_v39, %v1689_v38  ;;  %v1837_v39 = vrot.slane %v3742_v41, %v3735_v36 }
 0x5b8   : > { %v1708_v63 = vpop.permute.xlu1 %1707  ;;  %v1704_v0 = vpop.permute.xlu0 %1703 }
 0x5b9   : > { %v1716_v46 = vmul.f32 %v1712_v17, %v1708_v63  ;;  %v1715_v48 = vmul.f32 %v1712_v17, %v1704_v0  ;;  %v1773_v63 = vld [vmem:[#allocation2 + $0x8] sm:$0xff] }
 0x5bb   : > { %v1720_v60 = vadd.f32 %v1716_v46, %v1692_v45  ;;  %v1719_v61 = vadd.f32 %v1715_v48, %v1691_v47 }
 0x5bc   : > { %v1728_v14 = vpop.permute.xlu1 %1727  ;;  %v1724_v15 = vpop.permute.xlu0 %1723 }
 0x5bd   : > { %v1742_v55 = vmul.f32 %v1740_v37, %v1728_v14  ;;  %v1741_v57 = vmul.f32 %v1740_v37, %v1724_v15 }
 0x5bf   : > { %v1746_v3 = vadd.f32 %v1742_v55, %v1718_v54  ;;  %v1745_v6 = vadd.f32 %v1741_v57, %v1717_v56  ;;  %v1870_v56 = vand.u32 127, %v1603_v30 }
 0x5c0   : > { %v1736_v40 = vpop.permute.xlu1 %1735  ;;  %v1732_v44 = vpop.permute.xlu0 %1731 }
 0x5c1   : > { %v1744_v59 = vmul.f32 %v1740_v37, %v1736_v40  ;;  %v1743_v62 = vmul.f32 %v1740_v37, %v1732_v44  ;;  %v3348_v40 = vmov 0   ;;  %v1875_v57 = vadd.s32 4294967288, %v1870_v56 }
 0x5c2   : > { %3202 = vset.pattern.permute.xlu0 %v3348_v40  ;;  %3203 = vset.pattern.permute.xlu1 %v3348_v40 }
 0x5c3   : > { %v1748_v10 = vadd.f32 %v1744_v59, %v1720_v60  ;;  %v1747_v12 = vadd.f32 %v1743_v62, %v1719_v61  ;;  %v3781_v60 = vsub.s32 %v1875_v57, %v3728_v31  ;;  %v2332_v57 = vld [vmem:[%s4050_s21 + $0x10] sm:$0xff] }
 0x5c4   : > { %v1829_v44 = vpop.permute.xlu1 %1828 }
 0x66a   : > { %v1510_v49 = vpop.f32.mrb[2].mxu1  ;;  %v3762_v50 = vpop.f32.mrb[10].mxu0 }
 0x66b   : > { %v1756_v51 = vrot.slane %v1510_v49, %v1755_v32  ;;  %v2984_v52 = vpop.f32.mrb[3].mxu1  ;;  %v3011_v53 = vpop.f32.mrb[11].mxu0 }
 0x66d   : > { %v1757_v58 = vcombine.high %v1756_v51, %v1756_v51  ;;  %v1764_v43 = vrot.slane %v1756_v51, %v1755_v32 }
 0x66f   : > { %v1771_v2 = vrot.slane %v1757_v58, %v1755_v32  ;;  %v1779_v0 = vrot.slane %v1764_v43, %v3732_v34  ;;  %v3778_v43 = vsub.s32 %v1870_v56, %v3728_v31  ;;  %v2057_v56 = vld [vmem:[%s4046_s17 + $0x18] sm:$0xff] }
 0x671   : > { %v1783_v7 = vrot.slane %v1771_v2, %v3732_v34  ;;  %v1786_v8 = vadd.f32 %v1779_v0, %v1772_v1  ;;  %v1787_v9 = vadd.f32 %v1779_v0, %v1773_v63 }
 0x673   : > { %v1788_v13 = vadd.f32 %v1783_v7, %v1774_v4  ;;  %v1789_v14 = vadd.f32 %v1783_v7, %v1775_v5  ;;  %v1790_v15 = vadd.f32 %v1786_v8, %v1745_v6  ;;  %v1791_v16 = vadd.f32 %v1787_v9, %v1746_v3 }
 0x675   : > { %v1792_v17 = vadd.f32 %v1788_v13, %v1747_v12  ;;  %v1793_v19 = vadd.f32 %v1789_v14, %v1748_v10  ;;  %3212 = vtanh.f32 %v1790_v15 }
 0x676   : > { %3214 = vtanh.f32 %v1791_v16 }
 0x677   : > { %3216 = vtanh.f32 %v1792_v17 }
 0x678   : > { %3218 = vtanh.f32 %v1793_v19 }
 0x67f   : > { %v3213_v22 = vpop.eup %3212 }
 0x680   : > { %v3215_v23 = vpop.eup %3214  ;;  %v1805_v24 = vmul.f32 %v3213_v22, %v2828_v20 }
 0x681   : > { %v3217_v25 = vpop.eup %3216  ;;  %v1806_v26 = vmul.f32 %v3215_v23, %v2828_v20 }
 0x682   : > { %v1809_v27 = vsel %vm1237_vm7, %v1805_v24, 0.0  ;;  %v1807_v28 = vmul.f32 %v3217_v25, %v2828_v20  ;;  %v3219_v32 = vpop.eup %3218 }
 0x683   : > { %v1812_v33 = vsel %vm1237_vm7, %v1806_v26, 0.0  ;;  %1810 = vadd.xlane.f32.xlu0 %v1809_v27  ;;  %v1808_v37 = vmul.f32 %v3219_v32, %v2828_v20 }
 0x684   : > { %1813 = vadd.xlane.f32.xlu1 %v1812_v33  ;;  %v1815_v35 = vsel %vm1237_vm7, %v1807_v28, 0.0 }
 0x685   : > { %v1818_v38 = vsel %vm1237_vm7, %v1808_v37, 0.0 }
 0x687   : > { %1816 = vadd.xlane.f32.xlu0 %v1815_v35 }
 0x68b   : > { %1819 = vadd.xlane.f32.xlu0 %v1818_v38 }
 0x695   : > { %1839 = vbcast.lane.b32.xlu1 %v1837_v39, 256 }
 0x699   : > { %1843 = vbcast.lane.b32.xlu1 %v1837_v39, 264 }
 0x6a1   : > { %1832 = vbcast.lane.b32.xlu0 %v3746_v42, 264 }
 0x710   : > { %v1811_v45 = vpop.xlane.xlu0 %1810 }
 0x711   : > { %v1814_v46 = vpop.xlane.xlu1 %1813  ;;  %v1849_v47 = vadd.f32 %v1829_v44, %v1811_v45 }
 0x713   : > { %1858 = vperm.xlu0 %3202, %v1849_v47  }
 0x714   : > { %v1817_v48 = vpop.xlane.xlu0 %1816 }
 0x715   : > { %v1840_v49 = vpop.permute.xlu1 %1839 }
 0x716   : > { %v1851_v55 = vadd.f32 %v1840_v49, %v1817_v48 }
 0x718   : > { %v1820_v51 = vpop.xlane.xlu0 %1819 }
 0x719   : > { %v1844_v52 = vpop.permute.xlu1 %1843 }
 0x71a   : > { %v1852_v53 = vadd.f32 %v1844_v52, %v1820_v51  ;;  %v2054_v52 = vld [vmem:[%s4046_s17] sm:$0xff] }
 0x71c   : > { %1867 = vperm.xlu0 %3202, %v1852_v53   ;;  %v1833_v54 = vpop.permute.xlu0 %1832 }
 0x71d   : > { %v1850_v41 = vadd.f32 %v1833_v54, %v1814_v46  ;;  %v2331_v54 = vld [vmem:[%s4050_s21 + $0x8] sm:$0xff] }
 0x71f   : > { %1861 = vperm.xlu1 %3203, %v1850_v41  }
 0x723   : > { %1864 = vperm.xlu1 %3203, %v1851_v55  }
 0x792   : > { %v1859_v42 = vpop.permute.xlu0 %1858 }
 0x793   : > { %v1874_v1 = vrot.slane %v1859_v42, %v3778_v43 }
 0x79b   : > { %v1868_v59 = vpop.permute.xlu0 %1867 }
 0x79c   : > { %v1889_v63 = vrot.slane %v1868_v59, %v3781_v60 }
 0x79e   : > { %v1862_v58 = vpop.permute.xlu1 %1861 }
 0x79f   : > { %v1879_v61 = vrot.slane %v1862_v58, %v3781_v60  ;;  %v2333_v58 = vld [vmem:[%s4050_s21 + $0x18] sm:$0xff] }
 0x7a0   : > { %v3124_v59 = vpack.c.bf16 %v2333_v58, %v2332_v57  ;;  %v2832_v58 = vld [vmem:[%s4048_s19] ss:$0 sm:$0xff] }
 0x7a1   : > { %v1881_v2 = vsel %vm1880_vm13, %v1879_v61, %v1874_v1  ;;  %v1978_v61 = vld [vmem:[%s4126_s30 + $0x8] sm:$0xff] }
 0x7a2   : > { %v1865_v62 = vpop.permute.xlu1 %1864 }
 0x7a3   : > { %v1885_v30 = vrot.slane %v1865_v62, %v3778_v43  ;;  %v1977_v62 = vld [vmem:[%s4126_s30] sm:$0xff] }
 0x7a5   : > { %v1890_v0 = vsel %vm1880_vm13, %v1889_v63, %v1885_v30 }
 0x7a6   : > { %v1892_v31 = vsel %vm1891_vm14, %v1890_v0, %v1881_v2 }
 0x7a7   : > { %v1895_v3 = vsel %vm1894_vm15, %v1892_v31, -inf }
 0x7a8   : > { %1896 = vmax.xlane.f32.xlu1 %v1895_v3 }
 0x835   : > { %v1897_v4 = vpop.xlane.xlu1 %1896 }
 0x836   : > { %v1902_v5 = vrot.slane %v1897_v4, %v3732_v34  ;;  %v1906_v6 = vrot.slane %v1897_v4, %v3735_v36  ;;  %v1979_v4 = vld [vmem:[%s4126_s30 + $0x10] sm:$0xff] }
 0x838   : > { %v1909_v7 = vsub.f32 %v1849_v47, %v1902_v5  ;;  %v1910_v8 = vsub.f32 %v1850_v41, %v1902_v5  ;;  %v1911_v10 = vsub.f32 %v1851_v55, %v1906_v6  ;;  %v1912_v13 = vsub.f32 %v1852_v53, %v1906_v6  ;;  %v2056_v55 = vld [vmem:[%s4046_s17 + $0x10] sm:$0xff] }
 0x839   : > { %v3106_v42 = vpack.c.bf16 %v2057_v56, %v2056_v55 }
 0x83a   : > { %v1913_v9 = vmul.f32 1.442695, %v1909_v7  ;;  %v1915_v12 = vmul.f32 1.442695, %v1910_v8  ;;  %v1917_v14 = vmul.f32 1.442695, %v1911_v10 }
 0x83b   : > { %v1919_v15 = vmul.f32 1.442695, %v1912_v13  ;;  %v1980_v7 = vld [vmem:[%s4126_s30 + $0x18] sm:$0xff]  ;;  %s2841_s30 = sshll.u32 %s3521_s25, 5 }
 0x83c   : > { %3220 = vpow2.f32 %v1913_v9 }
 0x83d   : > { %3222 = vpow2.f32 %v1915_v12 }
 0x83e   : > { %3224 = vpow2.f32 %v1917_v14 }
 0x83f   : > { %3226 = vpow2.f32 %v1919_v15 }
 0x846   : > { %v3221_v16 = vpop.eup %3220 }
 0x847   : > { %1926 = vperm.xlu0 %3202, %v3221_v16   ;;  %v3223_v17 = vpop.eup %3222 }
 0x848   : > { %v3225_v19 = vpop.eup %3224 }
 0x849   : > { %v3227_v20 = vpop.eup %3226 }
 0x84b   : > { %1929 = vperm.xlu0 %3202, %v3223_v17  }
 0x84f   : > { %1932 = vperm.xlu0 %3202, %v3225_v19  }
 0x853   : > { %1935 = vperm.xlu0 %3202, %v3227_v20  }
 0x8c6   : > { %v1927_v22 = vpop.permute.xlu0 %1926 }
 0x8c7   : > { %v1940_v27 = vrot.slane %v1927_v22, %v3778_v43 }
 0x8ca   : > { %v1930_v23 = vpop.permute.xlu0 %1929 }
 0x8cb   : > { %v1944_v25 = vrot.slane %v1930_v23, %v3781_v60 }
 0x8cd   : > { %v1945_v33 = vsel %vm1880_vm13, %v1944_v25, %v1940_v27 }
 0x8ce   : > { %v1933_v24 = vpop.permute.xlu0 %1932 }
 0x8cf   : > { %v1949_v28 = vrot.slane %v1933_v24, %v3778_v43 }
 0x8d2   : > { %v1936_v26 = vpop.permute.xlu0 %1935 }
 0x8d3   : > { %v1953_v32 = vrot.slane %v1936_v26, %v3781_v60 }
 0x8d5   : > { %v1954_v35 = vsel %vm1880_vm13, %v1953_v32, %v1949_v28 }
 0x8d6   : > { %v1955_v37 = vsel %vm1891_vm14, %v1954_v35, %v1945_v33  ;;  %v2201_v35 = vld [vmem:[%s4047_s18] sm:$0xff] }
 0x8d7   : > { %v1957_v38 = vsel %vm1894_vm15, %v1955_v37, 0.0  ;;  %v2202_v37 = vld [vmem:[%s4047_s18 + $0x8] sm:$0xff] }
 0x8d8   : > { %1958 = vadd.xlane.f32.xlu0 %v1957_v38  ;;  %v2489_v38 = vld [vmem:[%s4053_s24 + $0x8] sm:$0xff] }
 0x965   : > { %v1959_v39 = vpop.xlane.xlu0 %1958 }
 0x966   : > { %v1964_v40 = vrot.slane %v1959_v39, %v3732_v34  ;;  %v1968_v44 = vrot.slane %v1959_v39, %v3735_v36  ;;  %v2055_v34 = vld [vmem:[%s4046_s17 + $0x8] sm:$0xff]  ;;  %v2330_v36 = vld [vmem:[%s4050_s21] sm:$0xff] }
 0x967   : > { %v3103_v53 = vpack.c.bf16 %v2055_v34, %v2054_v52  ;;  %v3121_v41 = vpack.c.bf16 %v2331_v54, %v2330_v36 }
 0x968   : > { %3228 = vrcp.f32 %v1964_v40 }
 0x969   : > { %3230 = vrcp.f32 %v1968_v44  ;;  %3104 = vmatpush3.bf16.msra.mxu1 %v3103_v53  ;;  %3122 = vmatpush3.bf16.msra.mxu0 %v3121_v41  ;;  %v2200_v53 = vld [vmem:[#allocation5] sm:$0x3] }
 0x96a   : > { %3105 = vmatprep.subr.bf16.mxu1 %v3343_v21  ;;  %3123 = vmatprep.subr.bf16.mxu0 %v3343_v21 }
 0x96d   : > { %3107 = vmatpush3.bf16.msra.mxu1 %v3106_v42  ;;  %3125 = vmatpush3.bf16.msra.mxu0 %v3124_v59 }
 0x96e   : > { %3114 = vmatprep.subr.bf16.mxu1 %v3343_v21  ;;  %3132 = vmatprep.subr.bf16.mxu0 %v3343_v21 }
 0x972   : > { %v3229_v45 = vpop.eup %3228 }
 0x973   : > { %v1973_v46 = vmul.f32 %v3229_v45, %v3223_v17  ;;  %v1972_v47 = vmul.f32 %v3229_v45, %v3221_v16  ;;  %v3231_v48 = vpop.eup %3230  ;;  %v3115_v45 = vpack.c.bf16 %v2202_v37, %v2201_v35 }
 0x974   : > { %v1975_v49 = vmul.f32 %v3231_v48, %v3225_v19  ;;  %v1976_v51 = vmul.f32 %v3231_v48, %v3227_v20  ;;  %v2204_v48 = vld [vmem:[%s4047_s18 + $0x18] sm:$0xff] }
 0x975   : > { %1988 = vperm.xlu0 %3202, %v1973_v46   ;;  %1983 = vperm.xlu1 %3203, %v1972_v47   ;;  %v2203_v47 = vld [vmem:[%s4047_s18 + $0x10] sm:$0xff] }
 0x976   : > { %v3118_v34 = vpack.c.bf16 %v2204_v48, %v2203_v47 }
 0x979   : > { %1993 = vperm.xlu1 %3203, %v1975_v49   ;;  %v2490_v49 = vld [vmem:[%s4053_s24 + $0x10] sm:$0xff] }
 0x97d   : > { %1998 = vperm.xlu1 %3203, %v1976_v51   ;;  %v2491_v51 = vld [vmem:[%s4053_s24 + $0x18] sm:$0xff] }
 0x97e   : > { %v3136_v36 = vpack.c.bf16 %v2491_v51, %v2490_v49 }
 0x9f4   : > { %v1989_v1 = vpop.permute.xlu0 %1988  ;;  %v1984_v63 = vpop.permute.xlu1 %1983 }
 0x9f5   : > { %v2002_v30 = vmul.f32 %v1989_v1, %v1978_v61  ;;  %v2001_v2 = vmul.f32 %v1984_v63, %v1977_v62  ;;  %v2030_v8 = vrot.slane %v1989_v1, %v3781_v60  ;;  %v2026_v9 = vrot.slane %v1984_v63, %v3778_v43 }
 0x9f7   : > { %v2006_v0 = vsel %vm1082_vm6, %v2002_v30, 0.0  ;;  %v2005_v31 = vsel %vm1082_vm6, %v2001_v2, 0.0  ;;  %v2031_v17 = vsel %vm1880_vm13, %v2030_v8, %v2026_v9  ;;  %v2294_v2 = vld [vmem:[#allocation6] sm:$0x3] }
 0x9f8   : > { %v2007_v3 = vadd.f32 %v2006_v0, %v2005_v31  ;;  %v1994_v5 = vpop.permute.xlu1 %1993 }
 0x9f9   : > { %v2003_v10 = vmul.f32 %v1994_v5, %v1979_v4  ;;  %v2035_v14 = vrot.slane %v1994_v5, %v3778_v43 }
 0x9fa   : > { %v2008_v6 = vrot.slane %v2007_v3, 4 }
 0x9fb   : > { %v2014_v19 = vsel %vm1082_vm6, %v2003_v10, 0.0 }
 0x9fc   : > { %v2009_v12 = vadd.f32 %v2008_v6, %v2007_v3  ;;  %v1999_v13 = vpop.permute.xlu1 %1998 }
 0x9fd   : > { %v2004_v15 = vmul.f32 %v1999_v13, %v1980_v7  ;;  %v2039_v16 = vrot.slane %v1999_v13, %v3781_v60  ;;  %v2327_v13 = vld [vmem:[%s4049_s20 + $0x8] sm:$0xff] }
 0x9fe   : > { %v2010_v23 = vrot.slane %v2009_v12, 2 }
 0x9ff   : > { %v2015_v20 = vsel %vm1082_vm6, %v2004_v15, 0.0  ;;  %v2040_v22 = vsel %vm1880_vm13, %v2039_v16, %v2035_v14  ;;  %v2328_v14 = vld [vmem:[%s4049_s20 + $0x10] sm:$0xff]  ;;  %v2329_v16 = vld [vmem:[%s4049_s20 + $0x18] sm:$0xff] }
 0xa00   : > { %v2016_v24 = vadd.f32 %v2015_v20, %v2014_v19  ;;  %v2041_v25 = vsel %vm1891_vm14, %v2040_v22, %v2031_v17  ;;  %v2011_v60 = vadd.f32 %v2010_v23, %v2009_v12  ;;  %v2326_v12 = vld [vmem:[%s4049_s20] sm:$0xff]  ;;  %v3130_v17 = vpack.c.bf16 %v2329_v16, %v2328_v14 }
 0xa01   : > { %v2043_v26 = vadd.f32 %v2041_v25, %v3724_v29  ;;  %2647 = vst.msk [vmem:[%s3566_s6] sm:$0x3] %vm1894_vm15, %v2041_v25  ;;  %v2488_v29 = vld [vmem:[%s4053_s24] sm:$0xff]  ;;  %v3127_v15 = vpack.c.bf16 %v2327_v13, %v2326_v12  ;;  %v2485_v25 = vld [vmem:[%s4052_s23 + $0x8] sm:$0xff] }
 0xa02   : > { %v2017_v43 = vrot.slane %v2016_v24, 4  ;;  %v2012_v32 = vrot.slane %v2011_v60, 1  ;;  %v3133_v46 = vpack.c.bf16 %v2489_v38, %v2488_v29 }
 0xa03   : > { %2044 = vst.msk [vmem:[#allocation8] sm:$0x3] %vm1894_vm15, %v2043_v26 }
 0xa04   : > { %v2018_v27 = vadd.f32 %v2017_v43, %v2016_v24  ;;  %v2013_v40 = vadd.f32 %v2012_v32, %v2011_v60  ;;  %v2484_v24 = vld [vmem:[%s4052_s23] sm:$0xff]  ;;  %v2487_v43 = vld [vmem:[%s4052_s23 + $0x18] sm:$0xff] }
 0xa05   : > { %v3139_v26 = vpack.c.bf16 %v2485_v25, %v2484_v24 }
 0xa06   : > { %v2019_v28 = vrot.slane %v2018_v27, 2 }
 0xa08   : > { %v2020_v33 = vadd.f32 %v2019_v28, %v2018_v27 }
 0xa0a   : > { %v2021_v39 = vrot.slane %v2020_v33, 1 }
 0xa0c   : > { %v2022_v44 = vadd.f32 %v2021_v39, %v2020_v33 }
 0xa0e   : > { %v2047_v52 = vsel %vm1891_vm14, %v2022_v44, %v2013_v40 }
 0xa0f   : > { %2049 = vst.msk [vmem:[#allocation7] sm:$0x3] %vm1431_vm12, %v2047_v52  ;;  %2999 = vmatmul.mubr.msk.f32.vlgmr.msra.gmra.mrb[4].mxu1 %vm1082_vm6, %v2047_v52  ;;  %3032 = vmatmul.mubr.msk.f32.vlgmr.msra.gmra.mrb[12].mxu0 %vm1082_vm6, %v2047_v52 }
 0xa10   : > { %3116 = vmatpush3.bf16.msra.mxu1 %v3115_v45  ;;  %3134 = vmatpush3.bf16.msra.mxu0 %v3133_v46 }
 0xa11   : > { %3117 = vmatprep.subr.bf16.mxu1 %v3343_v21  ;;  %3135 = vmatprep.subr.bf16.mxu0 %v3343_v21 }
 0xa12   : > { %3020 = vmatprep.mubr.msk.f32.mxu1 %vm3342_vm5, %v3341_v18  ;;  %3053 = vmatprep.mubr.msk.f32.mxu0 %vm3342_vm5, %v3341_v18 }
 0xa14   : > { %3119 = vmatpush3.bf16.msra.mxu1 %v3118_v34  ;;  %3137 = vmatpush3.bf16.msra.mxu0 %v3136_v36 }
 0xa15   : > { %3126 = vmatprep.subr.bf16.mxu1 %v3343_v21 }
 0xa17   : > { %3021 = vmatmul.mubr.msk.f32.vlgmr.msra.gmra.mrb[6].mxu1 %vm1082_vm6, %v2200_v53  ;;  %3054 = vmatmul.mubr.msk.f32.vlgmr.msra.gmra.mrb[14].mxu0 %vm1082_vm6, %v2047_v52 }
 0xa18   : > { %3042 = vmatprep.mubr.msk.f32.mxu1 %vm3342_vm5, %v3341_v18  ;;  %3128 = vmatpush3.bf16.msra.mxu1 %v3127_v15 }
 0xa19   : > { %3129 = vmatprep.subr.bf16.mxu1 %v3343_v21 }
 0xa1c   : > { %3131 = vmatpush3.bf16.msra.mxu1 %v3130_v17 }
 0xa1d   : > { %3138 = vmatprep.subr.bf16.mxu1 %v3343_v21 }
 0xae2   : > { %v2126_v54 = vpop.f32.mrb[4].mxu1  ;;  %v3897_v41 = vpop.f32.mrb[12].mxu0 }
 0xae3   : > { %v2197_v55 = vadd.f32 %v3762_v50, %v2126_v54  ;;  %v3000_v56 = vpop.f32.mrb[5].mxu1  ;;  %v3033_v57 = vpop.f32.mrb[13].mxu0 }
 0xaea   : > { %v2274_v42 = vpop.f32.mrb[6].mxu1  ;;  %v3903_v59 = vpop.f32.mrb[14].mxu0 }
 0xaeb   : > { %v2278_v61 = vadd.f32 %v2274_v42, %v2197_v55  ;;  %v3022_v62 = vpop.f32.mrb[7].mxu1  ;;  %v3055_v1 = vpop.f32.mrb[15].mxu0 }
 0xaed   : > { %v2286_v63 = vadd.f32 %v2832_v58, %v2278_v61 }
 0xaef   : > { %3232 = vtanh.f32 %v2286_v63  ;;  %v2287_v50 = vsub.f32 0.0, %v2286_v63 }
 0xaf1   : > { %v2288_v0 = vmul.f32 1.442695, %v2287_v50 }
 0xaf3   : > { %3234 = vpow2.f32 %v2288_v0 }
 0xaf9   : > { %v3233_v30 = vpop.eup %3232 }
 0xafa   : > { %2301 = vrot.lane.b32.xlu1 %v3233_v30, %s4123_s0 }
 0xafd   : > { %v3235_v31 = vpop.eup %3234 }
 0xafe   : > { %2296 = vrot.lane.b32.xlu1 %v2294_v2, %s4124_s8  ;;  %v2290_v3 = vadd.f32 1.0, %v3235_v31 }
 0xb00   : > { %3236 = vrcp.f32 %v2290_v3 }
 0xb0a   : > { %v3237_v4 = vpop.eup %3236 }
 0xb6c   : > { %v2302_v5 = vpop.permute.xlu1 %2301 }
 0xb6d   : > { %v2304_v6 = vmul.f32 %v3237_v4, %v2302_v5 }
 0xb6f   : > { %2306 = vrot.lane.b32.xlu1 %v2304_v6, %s4124_s8 }
 0xb70   : > { %v2297_v7 = vpop.permute.xlu1 %2296 }
 0xb71   : > { %v2299_v8 = vmul.f32 %v3237_v4, %v2297_v7 }
 0xbe1   : > { %v2307_v9 = vpop.permute.xlu1 %2306 }
 0xbe2   : > { %v2309_v10 = vadd.f32 %v2307_v9, %v2299_v8 }
 0xbe4   : > { %3238 = vtanh.f32 %v2309_v10 }
 0xbee   : > { %v3239_v19 = vpop.eup %3238 }
 0xbef   : > { %2312 = vrot.lane.b32.xlu0 %v3239_v19, %s4123_s0  ;;  %s3350_s0 = smov [#allocation12]  }
 0xbf0   : > { %s3248_s5 = sshll.u32 %s3350_s0, 4  ;;  %s3249_s5 = int_to_ptr.vmem [resolvable:$false] %s3248_s5 }
 0xbf1   : > { %s3250_s10 = scalar_lea.vmem %s3249_s5, 64  ;;  %p3251_p1 = scmp.lt.s32.totalorder %s2687_s11, %s3249_s5 }
 0xbf2   : > { %p3252_p2 = scmp.lt.s32.totalorder %s3250_s10, %s3244_s3 }
 0xbf3   : > { %1434 = vrot.lane.b32.xlu0 %v3683_v11, %s3349_s29  ;;  %v2486_v11 = vld [vmem:[%s4052_s23 + $0x10] sm:$0xff] }
 0xbf4   : > { %v3142_v27 = vpack.c.bf16 %v2487_v43, %v2486_v11  ;;  %p3253_p3 = por %p3252_p2, %p3251_p1 }
 0xbf6   : > { %p3254_p4 = pnand %p3253_p3, %p3247_p0 }
 0xc61   : > { %v2313_v20 = vpop.permute.xlu0 %2312 }
 0xc62   : > { %v2315_v22 = vmul.f32 %v3237_v4, %v2313_v20 }
 0xc64   : > { %2317 = vrot.lane.b32.xlu1 %v2315_v22, %s4124_s8 }
 0xc65   : > { %v1435_v23 = vpop.permute.xlu0 %1434 }
 0xc66   : > { %1437 = vst.msk [vmem:[#allocation4] sm:$0x3] %vm1431_vm12, %v1435_v23 }
 0xc68   : > { %2322 = vrot.lane.b32.xlu1 %v2309_v10, %s3349_s29  ;;  %s3951_s29 = scalar_lea.hbm %s4056_s27, %s2841_s30 }
 0xcd6   : > { %v2318_v60 = vpop.permute.xlu1 %2317 }
 0xcd7   : > { %2320 = vst.msk [vmem:[#allocation5] sm:$0x3] %vm1431_vm12, %v2318_v60  ;;  %3043 = vmatmul.mubr.msk.f32.vlgmr.msra.gmra.mrb[8].mxu1 %vm1082_vm6, %v2318_v60 }
 0xcd8   : > { %3140 = vmatpush3.bf16.msra.mxu1 %v3139_v26  ;;  %3064 = vmatprep.mubr.msk.f32.mxu1 %vm3342_vm5, %v3341_v18 }
 0xcd9   : > { %3141 = vmatprep.subr.bf16.mxu1 %v3343_v21 }
 0xcda   : > { %v2323_v28 = vpop.permute.xlu1 %2322 }
 0xcdb   : > { %2325 = vst.msk [vmem:[#allocation6] sm:$0x3] %vm1431_vm12, %v2323_v28 }
 0xcdc   : > { %3143 = vmatpush3.bf16.msra.mxu1 %v3142_v27 }
 0xcdf   : > { %3065 = vmatmul.mubr.msk.f32.vlgmr.msra.gmra.mrb[10].mxu1 %vm1082_vm6, %v2318_v60 }
 0xce0   : > { %3257 = shalt.err (!%p3254_p4)
}
 0xce1   : > { %s3258_s6 = scalar_lea.hbm %s3951_s29, 32  ;;  %s3262_s28 = scalar_lea.hbm %s4056_s27, 128 }
 0xce2   : > { %p3259_p7 = scmp.ne.s32.totalorder %s3951_s29, %s3258_s6  ;;  %p3263_p10 = scmp.lt.u32.totalorder %s3951_s29, %s4056_s27 }
 0xce3   : > { %p3264_p11 = scmp.lt.u32.totalorder %s3262_s28, %s3258_s6  ;;  %p3266_p13 = scmp.lt.u32.totalorder %s3258_s6, %s3951_s29 }
 0xce4   : > { %p3260_p8 = pnand %p3259_p7, %p3538_p5 }
 0xce5   : > { %p3265_p12 = por %p3264_p11, %p3263_p10 }
 0xce6   : > { %p3261_p9 = pneg %p3260_p8 }
 0xce7   : > { %p3267_p0 = por %p3266_p13, %p3265_p12 }
 0xce9   : > { %p3268_p1 = pnand %p3267_p0, %p3261_p9 }
 0xceb   : > { %3271 = shalt.err (!%p3268_p1)
}
 0xcec   : > { %3149 = dma.vmem_to_hbm [thread:$0]  (%p3538_p5), %s2687_s11, 32, %s3951_s29, %s2656_s4   ;;  %v2835_v21 = vld [vmem:[%s4051_s22] ss:$0 sm:$0xff] }
 0xced   : > { %s2673_s10 = sshll.u32 %s3564_s9, 4  ;;  %s4127_s2 = sld [smem:[#allocation37_spill]]  ;;  %s3984_s10 = int_to_ptr.vmem [resolvable:$true] %s2673_s10 }
 0xcee   : > { %s2651_s29 = scalar_lea.sflag [#allocation11], %s3549_s1  ;;  %s3272_s11 = scalar_lea.vmem %s3984_s10, 32 }
 0xcef   : > { %p3273_p2 = scmp.ne.s32.totalorder %s3984_s10, %s3272_s11  ;;  %s3351_s4 = smov [#allocation10]  }
 0xcf0   : > { %s3276_s25 = sshll.u32 %s3351_s4, 4  ;;  %s3277_s25 = int_to_ptr.vmem [resolvable:$false] %s3276_s25 }
 0xcf1   : > { %p3274_p3 = pnand %p3273_p2, %p3538_p5  ;;  %s3278_s12 = scalar_lea.vmem %s3277_s25, 64 }
 0xcf2   : > { %p3279_p7 = scmp.lt.s32.totalorder %s3984_s10, %s3277_s25  ;;  %p3280_p8 = scmp.lt.s32.totalorder %s3278_s12, %s3272_s11 }
 0xcf3   : > { %s3982_s28 = scalar_lea.hbm %s4127_s2, %s2841_s30  ;;  %p3275_p4 = pneg %p3274_p3 }
 0xcf4   : > { %p3281_p9 = por %p3280_p8, %p3279_p7 }
 0xcf6   : > { %p3282_p10 = pnand %p3281_p9, %p3275_p4 }
 0xdaa   : > { %v2472_v18 = vpop.f32.mrb[8].mxu1 }
 0xdab   : > { %v2473_v32 = vadd.f32 %v2472_v18, %v3897_v41  ;;  %v3044_v33 = vpop.f32.mrb[9].mxu1 }
 0xdad   : > { %v2483_v35 = vadd.f32 %v2835_v21, %v2473_v32 }
 0xdaf   : > { %2646 = vst.msk [vmem:[%s3564_s9] sm:$0x3] %vm1894_vm15, %v2483_v35 }
 0xdb0   : > { %3285 = shalt.err (!%p3282_p10)
}
 0xdb1   : > { %s3286_s9 = scalar_lea.hbm %s3982_s28, 32  ;;  %s3290_s0 = scalar_lea.hbm %s4127_s2, 128 }
 0xdb2   : > { %p3287_p11 = scmp.ne.s32.totalorder %s3982_s28, %s3286_s9  ;;  %p3291_p0 = scmp.lt.u32.totalorder %s3982_s28, %s4127_s2 }
 0xdb3   : > { %p3292_p1 = scmp.lt.u32.totalorder %s3290_s0, %s3286_s9  ;;  %p3294_p3 = scmp.lt.u32.totalorder %s3286_s9, %s3982_s28 }
 0xdb4   : > { %p3288_p12 = pnand %p3287_p11, %p3538_p5 }
 0xdb5   : > { %p3293_p2 = por %p3292_p1, %p3291_p0 }
 0xdb6   : > { %p3289_p13 = pneg %p3288_p12 }
 0xdb7   : > { %p3295_p4 = por %p3294_p3, %p3293_p2 }
 0xdb9   : > { %p3296_p7 = pnand %p3295_p4, %p3289_p13 }
 0xdbb   : > { %3299 = shalt.err (!%p3296_p7)
}
 0xdbc   : > { %s4128_s6 = sld [smem:[#allocation23_spill]]  ;;  %v2628_v37 = vpop.f32.mrb[10].mxu1  ;;  %v2838_v29 = vld [vmem:[#allocation9] ss:$0 sm:$0xff]  ;;  %vm2648_vm0 = vcmask 1024  }
 0xdbd   : > { %3148 = dma.vmem_to_hbm [thread:$0]  (%p3538_p5), %s3984_s10, 32, %s3982_s28, %s2651_s29   ;;  %v2629_v38 = vadd.f32 %v2628_v37, %v3903_v59  ;;  %v3066_v39 = vpop.f32.mrb[11].mxu1 }
 0xdbf   : > { %v2639_v40 = vadd.f32 %v2838_v29, %v2629_v38 }
 0xdc1   : > { %v2640_v44 = vsub.f32 0.0, %v2639_v40 }
 0xdc3   : > { %v2641_v45 = vmul.f32 1.442695, %v2640_v44 }
 0xdc5   : > { %3240 = vpow2.f32 %v2641_v45 }
 0xdcf   : > { %v3241_v46 = vpop.eup %3240 }
 0xdd0   : > { %v2643_v47 = vadd.f32 1.0, %v3241_v46 }
 0xdd2   : > { %3242 = vrcp.f32 %v2643_v47 }
 0xddc   : > { %v3243_v48 = vpop.eup %3242 }
 0xddd   : > { %2649 = vst.msk [vmem:[%s4128_s6] sm:$0x3] %vm2648_vm0, %v3243_v48 }
 0xdde PF: > { %s4129_s7 = sld [smem:[#allocation19_spill]]  ;;  %s4130_s8 = sld [smem:[#allocation16_spill]] }
 0xde4   : > { %p3159_p5 = scmp.ge.s32.totalorder %s4129_s7, 2  ;;  %s2701_s10 = sand.u32 1, %s4130_s8  }
 0xde5   : > { %s2702_s28 = scalar_lea.sflag [#allocation11], %s2701_s10 }
 0xde6   : > { %p3153_p8 = pnand %p3159_p5, %p3542_p6 }
 0xde8   : > { %3317 = dma.done.wait (!%p3153_p8), %s2702_s28, 32  }
 0xde9   : > { %3319 = vsyncadd (!%p3153_p8), %s2702_s28, 4294967264  ;;  %s2711_s29 = scalar_lea.sflag [#allocation13], %s2701_s10 }
 0xdea   : > { %3321 = dma.done.wait (!%p3153_p8), %s2711_s29, 32  }
 0xdeb   : > { %3323 = vsyncadd (!%p3153_p8), %s2711_s29, 4294967264  ;;  %s4132_s6 = sld [smem:[#allocation20_spill]]  ;;  %s4133_s9 = sld [smem:[#allocation17_spill]] }
 0xdec   : > { %s4134_s30 = sld [smem:[#allocation18_spill]]  ;;  %s4135_s3 = sld [smem:[#allocation21_spill]] }
 0xdf1   : > { %p44_p9 = scmp.ge.s32.totalorder %s4132_s6, 6  }
 0xdf3   :  { %46 = sbr.rel (!%p44_p9) target bundleno = 21 (0x15), region = 192 }
 0xdfa   :  { %2723 = vsyncpa [#allocation11], 1 }
 0xdfb   :  { %2725 = vsyncpa [#allocation11 + $0x1], 1 }
 0xdfc   :  { %2726 = vsyncpa [#allocation13], 1 }
 0xdfd   :  { %2728 = vsyncpa [#allocation13 + $0x1], 1 }

</bundles_post_ra>
